<compile_context>
chip_gen: v7x
topology: tpu7x:2x2x1
jax: 0.10.0
libtpu: 0.0.40
codegen_flags: <defaults>
</compile_context>

<pallas_src>
import functools
import math

import jax
import jax.numpy as jnp
from jax import lax
from jax.experimental import pallas as pl
from jax.experimental.pallas import tpu as pltpu


LN_EPS = 1e-5
NEG_INF = -1e9


# ----------------------------- in-kernel helpers -----------------------------

def _layer_norm(x, w, b, eps=LN_EPS):
    mu = jnp.mean(x, axis=-1, keepdims=True)
    var = jnp.mean(jnp.square(x - mu), axis=-1, keepdims=True)
    return (x - mu) * lax.rsqrt(var + eps) * w + b


def _gelu_new(x):
    # HF GPT-2 "gelu_new" (tanh approximation), computed in f32.
    c = jnp.sqrt(2.0 / jnp.pi).astype(x.dtype)
    return 0.5 * x * (1.0 + jnp.tanh(c * (x + 0.044715 * x * x * x)))


# ----------------------- fused transformer-block stack -----------------------

def _fused_blocks_kernel(x_ref,
                         ln1w_ref, ln1b_ref, wqkv_ref, bqkv_ref,
                         wproj_ref, bproj_ref, ln2w_ref, ln2b_ref,
                         wfc1_ref, bfc1_ref, wfc2_ref, bfc2_ref,
                         o_ref, acc_ref, *, num_heads):
    l = pl.program_id(1)

    # Load the activations from HBM only once per batch element; keep them
    # resident in the f32 VMEM accumulator across the layer axis.
    @pl.when(l == 0)
    def _():
        acc_ref[...] = x_ref[0].astype(jnp.float32)

    x = acc_ref[...]                                   # (S, D) f32
    S, D = x.shape
    hd = D // num_heads

    # ---- self attention (pre-LN, causal, multi-head) ----
    h = _layer_norm(x, ln1w_ref[0], ln1b_ref[0])
    qkv = jnp.dot(h.astype(jnp.bfloat16), wqkv_ref[0],
                  preferred_element_type=jnp.float32) + bqkv_ref[0]
    q, k, v = qkv[:, :D], qkv[:, D:2 * D], qkv[:, 2 * D:]

    # Pre-scale q (S*hd multiplies instead of S*S after the score matmul).
    q = q * jnp.float32(1.0 / math.sqrt(hd))

    # Head-batched tensors built via leading-axis stacking (no k.T relayout;
    # contraction is on the last dim of both operands -> MXU-native form).
    qh = jnp.stack([q[:, i * hd:(i + 1) * hd] for i in range(num_heads)], axis=0)
    kh = jnp.stack([k[:, i * hd:(i + 1) * hd] for i in range(num_heads)], axis=0)
    vh = jnp.stack([v[:, i * hd:(i + 1) * hd] for i in range(num_heads)], axis=0)

    s = jnp.einsum('hqd,hkd->hqk',
                   qh.astype(jnp.bfloat16), kh.astype(jnp.bfloat16),
                   preferred_element_type=jnp.float32)            # (H,S,S) f32
    row = lax.broadcasted_iota(jnp.int32, (S, S), 0)
    col = lax.broadcasted_iota(jnp.int32, (S, S), 1)
    s = jnp.where((row >= col)[None], s, jnp.float32(NEG_INF))

    # Single softmax over all heads (f32); divide goes to the EUP slot.
    s = s - jnp.max(s, axis=-1, keepdims=True)
    p = jnp.exp(s)
    p = p * pl.reciprocal(jnp.sum(p, axis=-1, keepdims=True), approx=True)

    ctx = jnp.einsum('hqk,hkd->hqd',
                     p.astype(jnp.bfloat16), vh.astype(jnp.bfloat16),
                     preferred_element_type=jnp.float32)          # (H,S,hd)

    # Output projection: accumulate each head's context against the matching
    # (hd, D) slice of w_proj -> no lane-axis re-pack of the heads needed.
    proj = jnp.zeros((S, D), jnp.float32)
    for i in range(num_heads):
        proj = proj + jnp.dot(ctx[i].astype(jnp.bfloat16),
                              wproj_ref[0, i * hd:(i + 1) * hd, :],
                              preferred_element_type=jnp.float32)
    x = x + proj + bproj_ref[0]

    # ---- MLP (pre-LN) ----
    h2 = _layer_norm(x, ln2w_ref[0], ln2b_ref[0])
    ff = jnp.dot(h2.astype(jnp.bfloat16), wfc1_ref[0],
                 preferred_element_type=jnp.float32) + bfc1_ref[0]
    ff = _gelu_new(ff)
    ff = jnp.dot(ff.astype(jnp.bfloat16), wfc2_ref[0],
                 preferred_element_type=jnp.float32) + bfc2_ref[0]
    x = x + ff

    acc_ref[...] = x

    # Write back to HBM only once per batch element (after the last layer).
    @pl.when(l == pl.num_programs(1) - 1)
    def _():
        o_ref[0] = acc_ref[...].astype(o_ref.dtype)


_BLOCK_PARAM_ORDER = ("ln1_w", "ln1_b", "w_qkv", "b_qkv", "w_proj", "b_proj",
                      "ln2_w", "ln2_b", "w_fc1", "b_fc1", "w_fc2", "b_fc2")


def gpt_blocks_fused(x, stacked_params, num_heads):
    """Run all L transformer blocks in a single pipelined pallas_call."""
    B, S, D = x.shape
    L = stacked_params["w_qkv"].shape[0]
    weights = [stacked_params[name] for name in _BLOCK_PARAM_ORDER]

    def layer_spec(arr):
        nd = arr.ndim
        blk = (1,) + arr.shape[1:]
        return pl.BlockSpec(blk, lambda b, l, _nd=nd: (l,) + (0,) * (_nd - 1))

    in_specs = ([pl.BlockSpec((1, S, D), lambda b, l: (b, 0, 0))]
                + [layer_spec(w) for w in weights])
    out_spec = pl.BlockSpec((1, S, D), lambda b, l: (b, 0, 0))

    # VMEM budget: double-buffered per-layer weights + x/out blocks + f32
    # activation scratch + headroom.  Capped at 64 MiB (v7x per-TC VMEM).
    per_step_bytes = 2 * S * D * x.dtype.itemsize          # x block + out block
    for w in weights:
        per_step_bytes += int(math.prod(w.shape[1:])) * w.dtype.itemsize
    vmem_limit = int(min(max(2 * per_step_bytes + 4 * S * D + (8 << 20),
                             32 << 20), 64 << 20))

    kernel = functools.partial(_fused_blocks_kernel, num_heads=num_heads)
    return pl.pallas_call(
        kernel,
        out_shape=jax.ShapeDtypeStruct((B, S, D), x.dtype),
        grid=(B, L),
        in_specs=in_specs,
        out_specs=out_spec,
        scratch_shapes=[pltpu.VMEM((S, D), jnp.float32)],
        compiler_params=pltpu.CompilerParams(
            dimension_semantics=("parallel", "arbitrary"),
            vmem_limit_bytes=vmem_limit),
    )(x, *weights)


# ------------------------------- LM head (tiled) ------------------------------

def _lm_head_kernel(x_ref, lnw_ref, lnb_ref, wlm_ref, o_ref, h_ref):
    j = pl.program_id(1)

    # LayerNorm(x) is computed once per batch element and reused across all
    # vocab tiles (stored in bf16, ready to feed the MXU).
    @pl.when(j == 0)
    def _():
        x = x_ref[0].astype(jnp.float32)
        h_ref[...] = _layer_norm(x, lnw_ref[...], lnb_ref[...]).astype(h_ref.dtype)

    o_ref[0] = jnp.dot(h_ref[...], wlm_ref[...],
                       preferred_element_type=jnp.float32).astype(o_ref.dtype)


def _pick_vocab_tile(V, max_tile=2048):
    if V <= max_tile:
        return V
    t = (max_tile // 128) * 128
    while t >= 128:
        if V % t == 0:
            return t
        t -= 128
    # TODO(synk): pad the vocab to a multiple of 128 for awkward vocab sizes.
    return V


def lm_head(x, head_params, *, max_vocab_tile=2048):
    B, S, D = x.shape
    V = head_params["w_lm"].shape[1]
    TV = _pick_vocab_tile(V, max_vocab_tile)

    per_step_bytes = (S * D * x.dtype.itemsize                   # x block
                      + D * TV * head_params["w_lm"].dtype.itemsize
                      + S * TV * x.dtype.itemsize                # out block
                      + 2 * D * 4)                               # ln params
    vmem_limit = int(min(max(2 * per_step_bytes + 2 * S * D + (8 << 20),
                             32 << 20), 64 << 20))

    return pl.pallas_call(
        _lm_head_kernel,
        out_shape=jax.ShapeDtypeStruct((B, S, V), x.dtype),
        grid=(B, V // TV),
        in_specs=[
            pl.BlockSpec((1, S, D), lambda b, j: (b, 0, 0)),
            pl.BlockSpec((1, D), lambda b, j: (0, 0)),
            pl.BlockSpec((1, D), lambda b, j: (0, 0)),
            pl.BlockSpec((D, TV), lambda b, j: (0, j)),
        ],
        out_specs=pl.BlockSpec((1, S, TV), lambda b, j: (b, 0, j)),
        scratch_shapes=[pltpu.VMEM((S, D), jnp.bfloat16)],
        compiler_params=pltpu.CompilerParams(
            dimension_semantics=("parallel", "arbitrary"),
            vmem_limit_bytes=vmem_limit),
    )(x, head_params["lnf_w"], head_params["lnf_b"], head_params["w_lm"])


# ------------------------------ GPTStageLast ----------------------------------

def init_block_params(key, D):
    ks = jax.random.split(key, 4)
    s = 0.02
    bf = jnp.bfloat16
    return {
        "ln1_w": jnp.ones((1, D), jnp.float32),
        "ln1_b": jnp.zeros((1, D), jnp.float32),
        "w_qkv": (s * jax.random.normal(ks[0], (D, 3 * D), jnp.float32)).astype(bf),
        "b_qkv": jnp.zeros((1, 3 * D), jnp.float32),
        "w_proj": (s * jax.random.normal(ks[1], (D, D), jnp.float32)).astype(bf),
        "b_proj": jnp.zeros((1, D), jnp.float32),
        "ln2_w": jnp.ones((1, D), jnp.float32),
        "ln2_b": jnp.zeros((1, D), jnp.float32),
        "w_fc1": (s * jax.random.normal(ks[2], (D, 4 * D), jnp.float32)).astype(bf),
        "b_fc1": jnp.zeros((1, 4 * D), jnp.float32),
        "w_fc2": (s * jax.random.normal(ks[3], (4 * D, D), jnp.float32)).astype(bf),
        "b_fc2": jnp.zeros((1, D), jnp.float32),
    }


def stack_block_params(params_list):
    """Stack per-layer parameter dicts along a leading layer axis."""
    return {k: jnp.stack([p[k] for p in params_list], axis=0)
            for k in params_list[0]}


def init_head_params(key, D, V):
    return {
        "lnf_w": jnp.ones((1, D), jnp.float32),
        "lnf_b": jnp.zeros((1, D), jnp.float32),
        # tied embedding weight (vocab, D) stored pre-transposed as (D, vocab)
        "w_lm": (0.02 * jax.random.normal(key, (D, V), jnp.float32)).astype(jnp.bfloat16),
    }


@functools.partial(jax.jit, static_argnames=("num_heads",))
def gpt_stage_last(x, stacked_block_params, head_params, num_heads):
    x = gpt_blocks_fused(x, stacked_block_params, num_heads)
    return lm_head(x, head_params)


# ---------------------------------- main ---------------------------------------

if __name__ == "__main__":
    B, S, D, H, L, V = 2, 8, 32, 4, 2, 128   # batch, seq, hidden, heads, layers, vocab

    key = jax.random.PRNGKey(0)
    kx, *kparams = jax.random.split(key, L + 2)

    x = jax.random.normal(kx, (B, S, D), jnp.float32)
    block_params = stack_block_params(
        [init_block_params(kparams[i], D) for i in range(L)])
    head_params = init_head_params(kparams[L], D, V)

    logits = gpt_stage_last(x, block_params, head_params, num_heads=H)
    jax.block_until_ready(logits)
    assert logits.shape == (B, S, V)
    assert bool(jnp.all(jnp.isfinite(logits)))
    print("KERNEL_OK")
</pallas_src>

<mosaic_0001>
module attributes {stable_mosaic.version = 11 : i64} {
  func.func @_lm_head_kernel(%arg0: i32, %arg1: i32, %arg2: memref<1x8x32xf32, #tpu.memory_space<vmem>>, %arg3: memref<1x32xf32, #tpu.memory_space<vmem>>, %arg4: memref<1x32xf32, #tpu.memory_space<vmem>>, %arg5: memref<32x128xbf16, #tpu.memory_space<vmem>>, %arg6: memref<1x8x128xf32, #tpu.memory_space<vmem>>, %arg7: memref<8x32xbf16, #tpu.memory_space<vmem>>) attributes {dimension_semantics = [#tpu.dimension_semantics<parallel>, #tpu.dimension_semantics<arbitrary>], iteration_bounds = array<i64: 2, 1>, scalar_prefetch = 0 : i64, scratch_operands = 1 : i64, tpu.core_type = #tpu.core_type<tc>, window_params = [{transform_indices = @transform_0, window_bounds = array<i64: 1, 8, 32>}, {pipeline_mode = #tpu.pipeline_mode<synchronous>, transform_indices = @transform_1, window_bounds = array<i64: 1, 32>}, {pipeline_mode = #tpu.pipeline_mode<synchronous>, transform_indices = @transform_2, window_bounds = array<i64: 1, 32>}, {transform_indices = @transform_3, window_bounds = array<i64: 32, 128>}, {transform_indices = @transform_4, window_bounds = array<i64: 1, 8, 128>}]} {
    %c0_i32 = arith.constant 0 : i32
    %0 = arith.cmpi eq, %arg1, %c0_i32 : i32
    %1 = arith.extui %0 : i1 to i32
    %c0_i32_0 = arith.constant 0 : i32
    %2 = arith.cmpi ne, %1, %c0_i32_0 : i32
    scf.if %2 {
      %c0_7 = arith.constant 0 : index
      %c0_8 = arith.constant 0 : index
      %c0_9 = arith.constant 0 : index
      %9 = vector.load %arg2[%c0_7, %c0_8, %c0_9] : memref<1x8x32xf32, #tpu.memory_space<vmem>>, vector<1x8x32xf32>
      %10 = vector.shape_cast %9 : vector<1x8x32xf32> to vector<8x32xf32>
      %c0_10 = arith.constant 0 : index
      %c0_11 = arith.constant 0 : index
      %11 = vector.load %arg3[%c0_10, %c0_11] : memref<1x32xf32, #tpu.memory_space<vmem>>, vector<1x32xf32>
      %c0_12 = arith.constant 0 : index
      %c0_13 = arith.constant 0 : index
      %12 = vector.load %arg4[%c0_12, %c0_13] : memref<1x32xf32, #tpu.memory_space<vmem>>, vector<1x32xf32>
      %cst_14 = arith.constant dense<0.000000e+00> : vector<8xf32>
      %13 = vector.multi_reduction <add>, %10, %cst_14 [1] : vector<8x32xf32> to vector<8xf32>
      %14 = vector.shape_cast %13 : vector<8xf32> to vector<8x1xf32>
      %cst_15 = arith.constant 3.200000e+01 : f32
      %15 = vector.broadcast %cst_15 : f32 to vector<8x1xf32>
      %16 = arith.divf %14, %15 : vector<8x1xf32>
      %17 = vector.broadcast %16 : vector<8x1xf32> to vector<8x32xf32>
      %18 = arith.subf %10, %17 : vector<8x32xf32>
      %19 = arith.mulf %18, %18 : vector<8x32xf32>
      %cst_16 = arith.constant dense<0.000000e+00> : vector<8xf32>
      %20 = vector.multi_reduction <add>, %19, %cst_16 [1] : vector<8x32xf32> to vector<8xf32>
      %21 = vector.shape_cast %20 : vector<8xf32> to vector<8x1xf32>
      %cst_17 = arith.constant 3.200000e+01 : f32
      %22 = vector.broadcast %cst_17 : f32 to vector<8x1xf32>
      %23 = arith.divf %21, %22 : vector<8x1xf32>
      %24 = vector.broadcast %16 : vector<8x1xf32> to vector<8x32xf32>
      %25 = arith.subf %10, %24 : vector<8x32xf32>
      %cst_18 = arith.constant 9.99999974E-6 : f32
      %26 = vector.broadcast %cst_18 : f32 to vector<8x1xf32>
      %27 = arith.addf %23, %26 : vector<8x1xf32>
      %28 = math.rsqrt %27 : vector<8x1xf32>
      %29 = vector.broadcast %28 : vector<8x1xf32> to vector<8x32xf32>
      %30 = arith.mulf %25, %29 : vector<8x32xf32>
      %31 = vector.broadcast %11 : vector<1x32xf32> to vector<8x32xf32>
      %32 = arith.mulf %30, %31 : vector<8x32xf32>
      %33 = vector.broadcast %12 : vector<1x32xf32> to vector<8x32xf32>
      %34 = arith.addf %32, %33 : vector<8x32xf32>
      %35 = arith.truncf %34 : vector<8x32xf32> to vector<8x32xbf16>
      %c0_19 = arith.constant 0 : index
      %c0_20 = arith.constant 0 : index
      %36 = vector.load %arg7[%c0_19, %c0_20] : memref<8x32xbf16, #tpu.memory_space<vmem>>, vector<8x32xbf16>
      tpu.vector_store %arg7[%c0_19, %c0_20], %35 {strides = array<i32>} : memref<8x32xbf16, #tpu.memory_space<vmem>>, vector<8x32xbf16>,
    } else {
    }
    %c0 = arith.constant 0 : index
    %c0_1 = arith.constant 0 : index
    %3 = vector.load %arg7[%c0, %c0_1] : memref<8x32xbf16, #tpu.memory_space<vmem>>, vector<8x32xbf16>
    %c0_2 = arith.constant 0 : index
    %c0_3 = arith.constant 0 : index
    %4 = vector.load %arg5[%c0_2, %c0_3] : memref<32x128xbf16, #tpu.memory_space<vmem>>, vector<32x128xbf16>
    %cst = arith.constant dense<0.000000e+00> : vector<8x128xf32>
    %5 = tpu.matmul %3, %4, %cst {dimension_numbers = #tpu.dot_dimension_numbers<[1], [0], [0], [1], [0, 0, 1, 1], [], []>} : vector<8x32xbf16>, vector<32x128xbf16>, vector<8x128xf32> -> vector<8x128xf32>
    %c0_4 = arith.constant 0 : index
    %c0_5 = arith.constant 0 : index
    %c0_6 = arith.constant 0 : index
    %6 = vector.load %arg6[%c0_4, %c0_5, %c0_6] : memref<1x8x128xf32, #tpu.memory_space<vmem>>, vector<1x8x128xf32>
    %7 = vector.shape_cast %6 : vector<1x8x128xf32> to vector<8x128xf32>
    %8 = vector.shape_cast %5 : vector<8x128xf32> to vector<1x8x128xf32>
    tpu.vector_store %arg6[%c0_4, %c0_5, %c0_6], %8 {strides = array<i32>} : memref<1x8x128xf32, #tpu.memory_space<vmem>>, vector<1x8x128xf32>,
    return
  }
  func.func @transform_0(%arg0: i32, %arg1: i32) -> (i32, i32, i32) {
    %c0_i32 = arith.constant 0 : i32
    %c0_i32_0 = arith.constant 0 : i32
    %c0_i32_1 = arith.constant 0 : i32
    return %arg0, %c0_i32, %c0_i32_0 : i32, i32, i32
  }
  func.func @transform_1(%arg0: i32, %arg1: i32) -> (i32, i32) {
    %c0_i32 = arith.constant 0 : i32
    %c0_i32_0 = arith.constant 0 : i32
    %c0_i32_1 = arith.constant 0 : i32
    return %c0_i32, %c0_i32_0 : i32, i32
  }
  func.func @transform_2(%arg0: i32, %arg1: i32) -> (i32, i32) {
    %c0_i32 = arith.constant 0 : i32
    %c0_i32_0 = arith.constant 0 : i32
    %c0_i32_1 = arith.constant 0 : i32
    return %c0_i32, %c0_i32_0 : i32, i32
  }
  func.func @transform_3(%arg0: i32, %arg1: i32) -> (i32, i32) {
    %c0_i32 = arith.constant 0 : i32
    %c0_i32_0 = arith.constant 0 : i32
    return %c0_i32, %arg1 : i32, i32
  }
  func.func @transform_4(%arg0: i32, %arg1: i32) -> (i32, i32, i32) {
    %c0_i32 = arith.constant 0 : i32
    %c0_i32_0 = arith.constant 0 : i32
    return %arg0, %c0_i32, %arg1 : i32, i32, i32
  }
}

module attributes {stable_mosaic.version = 11 : i64} {
  func.func @_fused_blocks_kernel(%arg0: i32, %arg1: i32, %arg2: memref<1x8x32xf32, #tpu.memory_space<vmem>>, %arg3: memref<1x1x32xf32, #tpu.memory_space<vmem>>, %arg4: memref<1x1x32xf32, #tpu.memory_space<vmem>>, %arg5: memref<1x32x96xbf16, #tpu.memory_space<vmem>>, %arg6: memref<1x1x96xf32, #tpu.memory_space<vmem>>, %arg7: memref<1x32x32xbf16, #tpu.memory_space<vmem>>, %arg8: memref<1x1x32xf32, #tpu.memory_space<vmem>>, %arg9: memref<1x1x32xf32, #tpu.memory_space<vmem>>, %arg10: memref<1x1x32xf32, #tpu.memory_space<vmem>>, %arg11: memref<1x32x128xbf16, #tpu.memory_space<vmem>>, %arg12: memref<1x1x128xf32, #tpu.memory_space<vmem>>, %arg13: memref<1x128x32xbf16, #tpu.memory_space<vmem>>, %arg14: memref<1x1x32xf32, #tpu.memory_space<vmem>>, %arg15: memref<1x8x32xf32, #tpu.memory_space<vmem>>, %arg16: memref<8x32xf32, #tpu.memory_space<vmem>>) attributes {dimension_semantics = [#tpu.dimension_semantics<parallel>, #tpu.dimension_semantics<arbitrary>], iteration_bounds = array<i64: 2, 2>, scalar_prefetch = 0 : i64, scratch_operands = 1 : i64, tpu.core_type = #tpu.core_type<tc>, window_params = [{transform_indices = @transform_0, window_bounds = array<i64: 1, 8, 32>}, {transform_indices = @transform_1, window_bounds = array<i64: 1, 1, 32>}, {transform_indices = @transform_2, window_bounds = array<i64: 1, 1, 32>}, {transform_indices = @transform_3, window_bounds = array<i64: 1, 32, 96>}, {transform_indices = @transform_4, window_bounds = array<i64: 1, 1, 96>}, {transform_indices = @transform_5, window_bounds = array<i64: 1, 32, 32>}, {transform_indices = @transform_6, window_bounds = array<i64: 1, 1, 32>}, {transform_indices = @transform_7, window_bounds = array<i64: 1, 1, 32>}, {transform_indices = @transform_8, window_bounds = array<i64: 1, 1, 32>}, {transform_indices = @transform_9, window_bounds = array<i64: 1, 32, 128>}, {transform_indices = @transform_10, window_bounds = array<i64: 1, 1, 128>}, {transform_indices = @transform_11, window_bounds = array<i64: 1, 128, 32>}, {transform_indices = @transform_12, window_bounds = array<i64: 1, 1, 32>}, {transform_indices = @transform_13, window_bounds = array<i64: 1, 8, 32>}]} {
    %c0_i32 = arith.constant 0 : i32
    %0 = arith.cmpi eq, %arg1, %c0_i32 : i32
    %1 = arith.extui %0 : i1 to i32
    %c0_i32_0 = arith.constant 0 : i32
    %2 = arith.cmpi ne, %1, %c0_i32_0 : i32
    scf.if %2 {
      %c0_74 = arith.constant 0 : index
      %c0_75 = arith.constant 0 : index
      %c0_76 = arith.constant 0 : index
      %189 = vector.load %arg2[%c0_74, %c0_75, %c0_76] : memref<1x8x32xf32, #tpu.memory_space<vmem>>, vector<1x8x32xf32>
      %190 = vector.shape_cast %189 : vector<1x8x32xf32> to vector<8x32xf32>
      %c0_77 = arith.constant 0 : index
      %c0_78 = arith.constant 0 : index
      %191 = vector.load %arg16[%c0_77, %c0_78] : memref<8x32xf32, #tpu.memory_space<vmem>>, vector<8x32xf32>
      tpu.vector_store %arg16[%c0_77, %c0_78], %190 {strides = array<i32>} : memref<8x32xf32, #tpu.memory_space<vmem>>, vector<8x32xf32>,
    } else {
    }
    %c0 = arith.constant 0 : index
    %c0_1 = arith.constant 0 : index
    %3 = vector.load %arg16[%c0, %c0_1] : memref<8x32xf32, #tpu.memory_space<vmem>>, vector<8x32xf32>
    %c0_2 = arith.constant 0 : index
    %c0_3 = arith.constant 0 : index
    %c0_4 = arith.constant 0 : index
    %4 = vector.load %arg3[%c0_2, %c0_3, %c0_4] : memref<1x1x32xf32, #tpu.memory_space<vmem>>, vector<1x1x32xf32>
    %5 = vector.shape_cast %4 : vector<1x1x32xf32> to vector<1x32xf32>
    %c0_5 = arith.constant 0 : index
    %c0_6 = arith.constant 0 : index
    %c0_7 = arith.constant 0 : index
    %6 = vector.load %arg4[%c0_5, %c0_6, %c0_7] : memref<1x1x32xf32, #tpu.memory_space<vmem>>, vector<1x1x32xf32>
    %7 = vector.shape_cast %6 : vector<1x1x32xf32> to vector<1x32xf32>
    %cst = arith.constant dense<0.000000e+00> : vector<8xf32>
    %8 = vector.multi_reduction <add>, %3, %cst [1] : vector<8x32xf32> to vector<8xf32>
    %9 = vector.shape_cast %8 : vector<8xf32> to vector<8x1xf32>
    %cst_8 = arith.constant 3.200000e+01 : f32
    %10 = vector.broadcast %cst_8 : f32 to vector<8x1xf32>
    %11 = arith.divf %9, %10 : vector<8x1xf32>
    %12 = vector.broadcast %11 : vector<8x1xf32> to vector<8x32xf32>
    %13 = arith.subf %3, %12 : vector<8x32xf32>
    %14 = arith.mulf %13, %13 : vector<8x32xf32>
    %cst_9 = arith.constant dense<0.000000e+00> : vector<8xf32>
    %15 = vector.multi_reduction <add>, %14, %cst_9 [1] : vector<8x32xf32> to vector<8xf32>
    %16 = vector.shape_cast %15 : vector<8xf32> to vector<8x1xf32>
    %cst_10 = arith.constant 3.200000e+01 : f32
    %17 = vector.broadcast %cst_10 : f32 to vector<8x1xf32>
    %18 = arith.divf %16, %17 : vector<8x1xf32>
    %19 = vector.broadcast %11 : vector<8x1xf32> to vector<8x32xf32>
    %20 = arith.subf %3, %19 : vector<8x32xf32>
    %cst_11 = arith.constant 9.99999974E-6 : f32
    %21 = vector.broadcast %cst_11 : f32 to vector<8x1xf32>
    %22 = arith.addf %18, %21 : vector<8x1xf32>
    %23 = math.rsqrt %22 : vector<8x1xf32>
    %24 = vector.broadcast %23 : vector<8x1xf32> to vector<8x32xf32>
    %25 = arith.mulf %20, %24 : vector<8x32xf32>
    %26 = vector.broadcast %5 : vector<1x32xf32> to vector<8x32xf32>
    %27 = arith.mulf %25, %26 : vector<8x32xf32>
    %28 = vector.broadcast %7 : vector<1x32xf32> to vector<8x32xf32>
    %29 = arith.addf %27, %28 : vector<8x32xf32>
    %30 = arith.truncf %29 : vector<8x32xf32> to vector<8x32xbf16>
    %c0_12 = arith.constant 0 : index
    %c0_13 = arith.constant 0 : index
    %c0_14 = arith.constant 0 : index
    %31 = vector.load %arg5[%c0_12, %c0_13, %c0_14] : memref<1x32x96xbf16, #tpu.memory_space<vmem>>, vector<1x32x96xbf16>
    %32 = vector.shape_cast %31 : vector<1x32x96xbf16> to vector<32x96xbf16>
    %cst_15 = arith.constant dense<0.000000e+00> : vector<8x96xf32>
    %33 = tpu.matmul %30, %32, %cst_15 {dimension_numbers = #tpu.dot_dimension_numbers<[1], [0], [0], [1], [0, 0, 1, 1], [], []>} : vector<8x32xbf16>, vector<32x96xbf16>, vector<8x96xf32> -> vector<8x96xf32>
    %c0_16 = arith.constant 0 : index
    %c0_17 = arith.constant 0 : index
    %c0_18 = arith.constant 0 : index
    %34 = vector.load %arg6[%c0_16, %c0_17, %c0_18] : memref<1x1x96xf32, #tpu.memory_space<vmem>>, vector<1x1x96xf32>
    %35 = vector.shape_cast %34 : vector<1x1x96xf32> to vector<1x96xf32>
    %36 = vector.broadcast %35 : vector<1x96xf32> to vector<8x96xf32>
    %37 = arith.addf %33, %36 : vector<8x96xf32>
    %38 = vector.extract_strided_slice %37 {offsets = [0, 0], sizes = [8, 32], strides = [1, 1]} : vector<8x96xf32> to vector<8x32xf32>
    %39 = vector.extract_strided_slice %37 {offsets = [0, 32], sizes = [8, 32], strides = [1, 1]} : vector<8x96xf32> to vector<8x32xf32>
    %40 = vector.extract_strided_slice %37 {offsets = [0, 64], sizes = [8, 32], strides = [1, 1]} : vector<8x96xf32> to vector<8x32xf32>
    %cst_19 = arith.constant 0.353553385 : f32
    %41 = vector.broadcast %cst_19 : f32 to vector<8x32xf32>
    %42 = arith.mulf %38, %41 : vector<8x32xf32>
    %43 = vector.extract_strided_slice %42 {offsets = [0, 0], sizes = [8, 8], strides = [1, 1]} : vector<8x32xf32> to vector<8x8xf32>
    %44 = vector.extract_strided_slice %42 {offsets = [0, 8], sizes = [8, 8], strides = [1, 1]} : vector<8x32xf32> to vector<8x8xf32>
    %45 = vector.extract_strided_slice %42 {offsets = [0, 16], sizes = [8, 8], strides = [1, 1]} : vector<8x32xf32> to vector<8x8xf32>
    %46 = vector.extract_strided_slice %42 {offsets = [0, 24], sizes = [8, 8], strides = [1, 1]} : vector<8x32xf32> to vector<8x8xf32>
    %47 = vector.shape_cast %43 : vector<8x8xf32> to vector<1x8x8xf32>
    %48 = vector.shape_cast %44 : vector<8x8xf32> to vector<1x8x8xf32>
    %49 = vector.shape_cast %45 : vector<8x8xf32> to vector<1x8x8xf32>
    %50 = vector.shape_cast %46 : vector<8x8xf32> to vector<1x8x8xf32>
    %51 = tpu.concatenate %47, %48, %49, %50 in 0 : vector<1x8x8xf32>, vector<1x8x8xf32>, vector<1x8x8xf32>, vector<1x8x8xf32> -> vector<4x8x8xf32>
    %52 = vector.extract_strided_slice %39 {offsets = [0, 0], sizes = [8, 8], strides = [1, 1]} : vector<8x32xf32> to vector<8x8xf32>
    %53 = vector.extract_strided_slice %39 {offsets = [0, 8], sizes = [8, 8], strides = [1, 1]} : vector<8x32xf32> to vector<8x8xf32>
    %54 = vector.extract_strided_slice %39 {offsets = [0, 16], sizes = [8, 8], strides = [1, 1]} : vector<8x32xf32> to vector<8x8xf32>
    %55 = vector.extract_strided_slice %39 {offsets = [0, 24], sizes = [8, 8], strides = [1, 1]} : vector<8x32xf32> to vector<8x8xf32>
    %56 = vector.shape_cast %52 : vector<8x8xf32> to vector<1x8x8xf32>
    %57 = vector.shape_cast %53 : vector<8x8xf32> to vector<1x8x8xf32>
    %58 = vector.shape_cast %54 : vector<8x8xf32> to vector<1x8x8xf32>
    %59 = vector.shape_cast %55 : vector<8x8xf32> to vector<1x8x8xf32>
    %60 = tpu.concatenate %56, %57, %58, %59 in 0 : vector<1x8x8xf32>, vector<1x8x8xf32>, vector<1x8x8xf32>, vector<1x8x8xf32> -> vector<4x8x8xf32>
    %61 = vector.extract_strided_slice %40 {offsets = [0, 0], sizes = [8, 8], strides = [1, 1]} : vector<8x32xf32> to vector<8x8xf32>
    %62 = vector.extract_strided_slice %40 {offsets = [0, 8], sizes = [8, 8], strides = [1, 1]} : vector<8x32xf32> to vector<8x8xf32>
    %63 = vector.extract_strided_slice %40 {offsets = [0, 16], sizes = [8, 8], strides = [1, 1]} : vector<8x32xf32> to vector<8x8xf32>
    %64 = vector.extract_strided_slice %40 {offsets = [0, 24], sizes = [8, 8], strides = [1, 1]} : vector<8x32xf32> to vector<8x8xf32>
    %65 = vector.shape_cast %61 : vector<8x8xf32> to vector<1x8x8xf32>
    %66 = vector.shape_cast %62 : vector<8x8xf32> to vector<1x8x8xf32>
    %67 = vector.shape_cast %63 : vector<8x8xf32> to vector<1x8x8xf32>
    %68 = vector.shape_cast %64 : vector<8x8xf32> to vector<1x8x8xf32>
    %69 = tpu.concatenate %65, %66, %67, %68 in 0 : vector<1x8x8xf32>, vector<1x8x8xf32>, vector<1x8x8xf32>, vector<1x8x8xf32> -> vector<4x8x8xf32>
    %70 = arith.truncf %51 : vector<4x8x8xf32> to vector<4x8x8xbf16>
    %71 = arith.truncf %60 : vector<4x8x8xf32> to vector<4x8x8xbf16>
    "tpu.trace_start"() <{level = 10 : i32, message = "hqd,hkd->hqk"}> : () -> ()
    %cst_20 = arith.constant dense<0.000000e+00> : vector<4x8x8xf32>
    %72 = tpu.matmul %70, %71, %cst_20 {dimension_numbers = #tpu.dot_dimension_numbers<[2], [2], [1], [1], [0, 0, 0, 1, 1, 1], [0], [0]>} : vector<4x8x8xbf16>, vector<4x8x8xbf16>, vector<4x8x8xf32> -> vector<4x8x8xf32>
    "tpu.trace_stop"() : () -> ()
    %73 = tpu.iota {dimensions = array<i32: 0>} : vector<8x8xi32>
    %74 = tpu.iota {dimensions = array<i32: 1>} : vector<8x8xi32>
    %75 = arith.cmpi sge, %73, %74 : vector<8x8xi32>
    %76 = vector.shape_cast %75 : vector<8x8xi1> to vector<1x8x8xi1>
    %cst_21 = arith.constant -1.000000e+09 : f32
    %77 = vector.shape_cast %76 : vector<1x8x8xi1> to vector<1x8x8xi1>
    %78 = vector.broadcast %77 : vector<1x8x8xi1> to vector<4x8x8xi1>
    %79 = vector.broadcast %cst_21 : f32 to vector<4x8x8xf32>
    %80 = arith.select %78, %72, %79 : vector<4x8x8xi1>, vector<4x8x8xf32>
    %cst_22 = arith.constant dense<0xFF800000> : vector<4x8xf32>
    %81 = vector.multi_reduction <maximumf>, %80, %cst_22 [2] : vector<4x8x8xf32> to vector<4x8xf32>
    %82 = vector.shape_cast %81 : vector<4x8xf32> to vector<4x8x1xf32>
    %83 = vector.broadcast %82 : vector<4x8x1xf32> to vector<4x8x8xf32>
    %84 = arith.subf %80, %83 : vector<4x8x8xf32>
    %85 = math.exp %84 : vector<4x8x8xf32>
    %cst_23 = arith.constant dense<0.000000e+00> : vector<4x8xf32>
    %86 = vector.multi_reduction <add>, %85, %cst_23 [2] : vector<4x8x8xf32> to vector<4x8xf32>
    %87 = vector.shape_cast %86 : vector<4x8xf32> to vector<4x8x1xf32>
    %88 = tpu.reciprocal %87 {approx = true} : vector<4x8x1xf32> -> vector<4x8x1xf32>
    %89 = vector.broadcast %88 : vector<4x8x1xf32> to vector<4x8x8xf32>
    %90 = arith.mulf %85, %89 : vector<4x8x8xf32>
    %91 = arith.truncf %90 : vector<4x8x8xf32> to vector<4x8x8xbf16>
    %92 = arith.truncf %69 : vector<4x8x8xf32> to vector<4x8x8xbf16>
    "tpu.trace_start"() <{level = 10 : i32, message = "hqk,hkd->hqd"}> : () -> ()
    %cst_24 = arith.constant dense<0.000000e+00> : vector<4x8x8xf32>
    %93 = tpu.matmul %91, %92, %cst_24 {dimension_numbers = #tpu.dot_dimension_numbers<[2], [1], [1], [2], [0, 0, 0, 1, 1, 2], [0], [0]>} : vector<4x8x8xbf16>, vector<4x8x8xbf16>, vector<4x8x8xf32> -> vector<4x8x8xf32>
    %cst_25 = arith.constant 0.000000e+00 : f32
    "tpu.trace_stop"() : () -> ()
    %94 = vector.broadcast %cst_25 : f32 to vector<8x32xf32>
    %95 = vector.extract_strided_slice %93 {offsets = [0, 0, 0], sizes = [1, 8, 8], strides = [1, 1, 1]} : vector<4x8x8xf32> to vector<1x8x8xf32>
    %96 = vector.shape_cast %95 : vector<1x8x8xf32> to vector<8x8xf32>
    %97 = arith.truncf %96 : vector<8x8xf32> to vector<8x8xbf16>
    %c0_26 = arith.constant 0 : index
    %c0_27 = arith.constant 0 : index
    %c0_28 = arith.constant 0 : index
    %98 = vector.load %arg7[%c0_26, %c0_27, %c0_28] : memref<1x32x32xbf16, #tpu.memory_space<vmem>>, vector<1x8x32xbf16>
    %99 = vector.shape_cast %98 : vector<1x8x32xbf16> to vector<8x32xbf16>
    %cst_29 = arith.constant dense<0.000000e+00> : vector<8x32xf32>
    %100 = tpu.matmul %97, %99, %cst_29 {dimension_numbers = #tpu.dot_dimension_numbers<[1], [0], [0], [1], [0, 0, 1, 1], [], []>} : vector<8x8xbf16>, vector<8x32xbf16>, vector<8x32xf32> -> vector<8x32xf32>
    %101 = arith.addf %94, %100 : vector<8x32xf32>
    %102 = vector.extract_strided_slice %93 {offsets = [1, 0, 0], sizes = [1, 8, 8], strides = [1, 1, 1]} : vector<4x8x8xf32> to vector<1x8x8xf32>
    %103 = vector.shape_cast %102 : vector<1x8x8xf32> to vector<8x8xf32>
    %104 = arith.truncf %103 : vector<8x8xf32> to vector<8x8xbf16>
    %c0_30 = arith.constant 0 : index
    %c8 = arith.constant 8 : index
    %c0_31 = arith.constant 0 : index
    %105 = vector.load %arg7[%c0_30, %c8, %c0_31] : memref<1x32x32xbf16, #tpu.memory_space<vmem>>, vector<1x8x32xbf16>
    %106 = vector.shape_cast %105 : vector<1x8x32xbf16> to vector<8x32xbf16>
    %cst_32 = arith.constant dense<0.000000e+00> : vector<8x32xf32>
    %107 = tpu.matmul %104, %106, %cst_32 {dimension_numbers = #tpu.dot_dimension_numbers<[1], [0], [0], [1], [0, 0, 1, 1], [], []>} : vector<8x8xbf16>, vector<8x32xbf16>, vector<8x32xf32> -> vector<8x32xf32>
    %108 = arith.addf %101, %107 : vector<8x32xf32>
    %109 = vector.extract_strided_slice %93 {offsets = [2, 0, 0], sizes = [1, 8, 8], strides = [1, 1, 1]} : vector<4x8x8xf32> to vector<1x8x8xf32>
    %110 = vector.shape_cast %109 : vector<1x8x8xf32> to vector<8x8xf32>
    %111 = arith.truncf %110 : vector<8x8xf32> to vector<8x8xbf16>
    %c0_33 = arith.constant 0 : index
    %c16 = arith.constant 16 : index
    %c0_34 = arith.constant 0 : index
    %112 = vector.load %arg7[%c0_33, %c16, %c0_34] : memref<1x32x32xbf16, #tpu.memory_space<vmem>>, vector<1x8x32xbf16>
    %113 = vector.shape_cast %112 : vector<1x8x32xbf16> to vector<8x32xbf16>
    %cst_35 = arith.constant dense<0.000000e+00> : vector<8x32xf32>
    %114 = tpu.matmul %111, %113, %cst_35 {dimension_numbers = #tpu.dot_dimension_numbers<[1], [0], [0], [1], [0, 0, 1, 1], [], []>} : vector<8x8xbf16>, vector<8x32xbf16>, vector<8x32xf32> -> vector<8x32xf32>
    %115 = arith.addf %108, %114 : vector<8x32xf32>
    %116 = vector.extract_strided_slice %93 {offsets = [3, 0, 0], sizes = [1, 8, 8], strides = [1, 1, 1]} : vector<4x8x8xf32> to vector<1x8x8xf32>
    %117 = vector.shape_cast %116 : vector<1x8x8xf32> to vector<8x8xf32>
    %118 = arith.truncf %117 : vector<8x8xf32> to vector<8x8xbf16>
    %c0_36 = arith.constant 0 : index
    %c24 = arith.constant 24 : index
    %c0_37 = arith.constant 0 : index
    %119 = vector.load %arg7[%c0_36, %c24, %c0_37] : memref<1x32x32xbf16, #tpu.memory_space<vmem>>, vector<1x8x32xbf16>
    %120 = vector.shape_cast %119 : vector<1x8x32xbf16> to vector<8x32xbf16>
    %cst_38 = arith.constant dense<0.000000e+00> : vector<8x32xf32>
    %121 = tpu.matmul %118, %120, %cst_38 {dimension_numbers = #tpu.dot_dimension_numbers<[1], [0], [0], [1], [0, 0, 1, 1], [], []>} : vector<8x8xbf16>, vector<8x32xbf16>, vector<8x32xf32> -> vector<8x32xf32>
    %122 = arith.addf %115, %121 : vector<8x32xf32>
    %123 = arith.addf %3, %122 : vector<8x32xf32>
    %c0_39 = arith.constant 0 : index
    %c0_40 = arith.constant 0 : index
    %c0_41 = arith.constant 0 : index
    %124 = vector.load %arg8[%c0_39, %c0_40, %c0_41] : memref<1x1x32xf32, #tpu.memory_space<vmem>>, vector<1x1x32xf32>
    %125 = vector.shape_cast %124 : vector<1x1x32xf32> to vector<1x32xf32>
    %126 = vector.broadcast %125 : vector<1x32xf32> to vector<8x32xf32>
    %127 = arith.addf %123, %126 : vector<8x32xf32>
    %c0_42 = arith.constant 0 : index
    %c0_43 = arith.constant 0 : index
    %c0_44 = arith.constant 0 : index
    %128 = vector.load %arg9[%c0_42, %c0_43, %c0_44] : memref<1x1x32xf32, #tpu.memory_space<vmem>>, vector<1x1x32xf32>
    %129 = vector.shape_cast %128 : vector<1x1x32xf32> to vector<1x32xf32>
    %c0_45 = arith.constant 0 : index
    %c0_46 = arith.constant 0 : index
    %c0_47 = arith.constant 0 : index
    %130 = vector.load %arg10[%c0_45, %c0_46, %c0_47] : memref<1x1x32xf32, #tpu.memory_space<vmem>>, vector<1x1x32xf32>
    %131 = vector.shape_cast %130 : vector<1x1x32xf32> to vector<1x32xf32>
    %cst_48 = arith.constant dense<0.000000e+00> : vector<8xf32>
    %132 = vector.multi_reduction <add>, %127, %cst_48 [1] : vector<8x32xf32> to vector<8xf32>
    %133 = vector.shape_cast %132 : vector<8xf32> to vector<8x1xf32>
    %cst_49 = arith.constant 3.200000e+01 : f32
    %134 = vector.broadcast %cst_49 : f32 to vector<8x1xf32>
    %135 = arith.divf %133, %134 : vector<8x1xf32>
    %136 = vector.broadcast %135 : vector<8x1xf32> to vector<8x32xf32>
    %137 = arith.subf %127, %136 : vector<8x32xf32>
    %138 = arith.mulf %137, %137 : vector<8x32xf32>
    %cst_50 = arith.constant dense<0.000000e+00> : vector<8xf32>
    %139 = vector.multi_reduction <add>, %138, %cst_50 [1] : vector<8x32xf32> to vector<8xf32>
    %140 = vector.shape_cast %139 : vector<8xf32> to vector<8x1xf32>
    %cst_51 = arith.constant 3.200000e+01 : f32
    %141 = vector.broadcast %cst_51 : f32 to vector<8x1xf32>
    %142 = arith.divf %140, %141 : vector<8x1xf32>
    %143 = vector.broadcast %135 : vector<8x1xf32> to vector<8x32xf32>
    %144 = arith.subf %127, %143 : vector<8x32xf32>
    %cst_52 = arith.constant 9.99999974E-6 : f32
    %145 = vector.broadcast %cst_52 : f32 to vector<8x1xf32>
    %146 = arith.addf %142, %145 : vector<8x1xf32>
    %147 = math.rsqrt %146 : vector<8x1xf32>
    %148 = vector.broadcast %147 : vector<8x1xf32> to vector<8x32xf32>
    %149 = arith.mulf %144, %148 : vector<8x32xf32>
    %150 = vector.broadcast %129 : vector<1x32xf32> to vector<8x32xf32>
    %151 = arith.mulf %149, %150 : vector<8x32xf32>
    %152 = vector.broadcast %131 : vector<1x32xf32> to vector<8x32xf32>
    %153 = arith.addf %151, %152 : vector<8x32xf32>
    %154 = arith.truncf %153 : vector<8x32xf32> to vector<8x32xbf16>
    %c0_53 = arith.constant 0 : index
    %c0_54 = arith.constant 0 : index
    %c0_55 = arith.constant 0 : index
    %155 = vector.load %arg11[%c0_53, %c0_54, %c0_55] : memref<1x32x128xbf16, #tpu.memory_space<vmem>>, vector<1x32x128xbf16>
    %156 = vector.shape_cast %155 : vector<1x32x128xbf16> to vector<32x128xbf16>
    %cst_56 = arith.constant dense<0.000000e+00> : vector<8x128xf32>
    %157 = tpu.matmul %154, %156, %cst_56 {dimension_numbers = #tpu.dot_dimension_numbers<[1], [0], [0], [1], [0, 0, 1, 1], [], []>} : vector<8x32xbf16>, vector<32x128xbf16>, vector<8x128xf32> -> vector<8x128xf32>
    %c0_57 = arith.constant 0 : index
    %c0_58 = arith.constant 0 : index
    %c0_59 = arith.constant 0 : index
    %158 = vector.load %arg12[%c0_57, %c0_58, %c0_59] : memref<1x1x128xf32, #tpu.memory_space<vmem>>, vector<1x1x128xf32>
    %159 = vector.shape_cast %158 : vector<1x1x128xf32> to vector<1x128xf32>
    %160 = vector.broadcast %159 : vector<1x128xf32> to vector<8x128xf32>
    %161 = arith.addf %157, %160 : vector<8x128xf32>
    %cst_60 = arith.constant 0.636619746 : f32
    %162 = math.sqrt %cst_60 : f32
    %cst_61 = arith.constant 5.000000e-01 : f32
    %163 = vector.broadcast %cst_61 : f32 to vector<8x128xf32>
    %164 = arith.mulf %163, %161 : vector<8x128xf32>
    %cst_62 = arith.constant 4.471500e-02 : f32
    %165 = vector.broadcast %cst_62 : f32 to vector<8x128xf32>
    %166 = arith.mulf %165, %161 : vector<8x128xf32>
    %167 = arith.mulf %166, %161 : vector<8x128xf32>
    %168 = arith.mulf %167, %161 : vector<8x128xf32>
    %169 = arith.addf %161, %168 : vector<8x128xf32>
    %170 = vector.broadcast %162 : f32 to vector<8x128xf32>
    %171 = arith.mulf %170, %169 : vector<8x128xf32>
    %172 = math.tanh %171 : vector<8x128xf32>
    %cst_63 = arith.constant 1.000000e+00 : f32
    %173 = vector.broadcast %cst_63 : f32 to vector<8x128xf32>
    %174 = arith.addf %173, %172 : vector<8x128xf32>
    %175 = arith.mulf %164, %174 : vector<8x128xf32>
    %176 = arith.truncf %175 : vector<8x128xf32> to vector<8x128xbf16>
    %c0_64 = arith.constant 0 : index
    %c0_65 = arith.constant 0 : index
    %c0_66 = arith.constant 0 : index
    %177 = vector.load %arg13[%c0_64, %c0_65, %c0_66] : memref<1x128x32xbf16, #tpu.memory_space<vmem>>, vector<1x128x32xbf16>
    %178 = vector.shape_cast %177 : vector<1x128x32xbf16> to vector<128x32xbf16>
    %cst_67 = arith.constant dense<0.000000e+00> : vector<8x32xf32>
    %179 = tpu.matmul %176, %178, %cst_67 {dimension_numbers = #tpu.dot_dimension_numbers<[1], [0], [0], [1], [0, 0, 1, 1], [], []>} : vector<8x128xbf16>, vector<128x32xbf16>, vector<8x32xf32> -> vector<8x32xf32>
    %c0_68 = arith.constant 0 : index
    %c0_69 = arith.constant 0 : index
    %c0_70 = arith.constant 0 : index
    %180 = vector.load %arg14[%c0_68, %c0_69, %c0_70] : memref<1x1x32xf32, #tpu.memory_space<vmem>>, vector<1x1x32xf32>
    %181 = vector.shape_cast %180 : vector<1x1x32xf32> to vector<1x32xf32>
    %182 = vector.broadcast %181 : vector<1x32xf32> to vector<8x32xf32>
    %183 = arith.addf %179, %182 : vector<8x32xf32>
    %184 = arith.addf %127, %183 : vector<8x32xf32>
    %c0_71 = arith.constant 0 : index
    %c0_72 = arith.constant 0 : index
    %185 = vector.load %arg16[%c0_71, %c0_72] : memref<8x32xf32, #tpu.memory_space<vmem>>, vector<8x32xf32>
    tpu.vector_store %arg16[%c0_71, %c0_72], %184 {strides = array<i32>} : memref<8x32xf32, #tpu.memory_space<vmem>>, vector<8x32xf32>,
    %c1_i32 = arith.constant 1 : i32
    %186 = arith.cmpi eq, %arg1, %c1_i32 : i32
    %187 = arith.extui %186 : i1 to i32
    %c0_i32_73 = arith.constant 0 : i32
    %188 = arith.cmpi ne, %187, %c0_i32_73 : i32
    scf.if %188 {
      %c0_74 = arith.constant 0 : index
      %c0_75 = arith.constant 0 : index
      %189 = vector.load %arg16[%c0_74, %c0_75] : memref<8x32xf32, #tpu.memory_space<vmem>>, vector<8x32xf32>
      %c0_76 = arith.constant 0 : index
      %c0_77 = arith.constant 0 : index
      %c0_78 = arith.constant 0 : index
      %190 = vector.load %arg15[%c0_76, %c0_77, %c0_78] : memref<1x8x32xf32, #tpu.memory_space<vmem>>, vector<1x8x32xf32>
      %191 = vector.shape_cast %190 : vector<1x8x32xf32> to vector<8x32xf32>
      %192 = vector.shape_cast %189 : vector<8x32xf32> to vector<1x8x32xf32>
      tpu.vector_store %arg15[%c0_76, %c0_77, %c0_78], %192 {strides = array<i32>} : memref<1x8x32xf32, #tpu.memory_space<vmem>>, vector<1x8x32xf32>,
    } else {
    }
    return
  }
  func.func @transform_0(%arg0: i32, %arg1: i32) -> (i32, i32, i32) {
    %c0_i32 = arith.constant 0 : i32
    %c0_i32_0 = arith.constant 0 : i32
    %c0_i32_1 = arith.constant 0 : i32
    return %arg0, %c0_i32, %c0_i32_0 : i32, i32, i32
  }
  func.func @transform_1(%arg0: i32, %arg1: i32) -> (i32, i32, i32) {
    %c0_i32 = arith.constant 0 : i32
    %c0_i32_0 = arith.constant 0 : i32
    %c0_i32_1 = arith.constant 0 : i32
    return %arg1, %c0_i32, %c0_i32_0 : i32, i32, i32
  }
  func.func @transform_2(%arg0: i32, %arg1: i32) -> (i32, i32, i32) {
    %c0_i32 = arith.constant 0 : i32
    %c0_i32_0 = arith.constant 0 : i32
    %c0_i32_1 = arith.constant 0 : i32
    return %arg1, %c0_i32, %c0_i32_0 : i32, i32, i32
  }
  func.func @transform_3(%arg0: i32, %arg1: i32) -> (i32, i32, i32) {
    %c0_i32 = arith.constant 0 : i32
    %c0_i32_0 = arith.constant 0 : i32
    %c0_i32_1 = arith.constant 0 : i32
    return %arg1, %c0_i32, %c0_i32_0 : i32, i32, i32
  }
  func.func @transform_4(%arg0: i32, %arg1: i32) -> (i32, i32, i32) {
    %c0_i32 = arith.constant 0 : i32
    %c0_i32_0 = arith.constant 0 : i32
    %c0_i32_1 = arith.constant 0 : i32
    return %arg1, %c0_i32, %c0_i32_0 : i32, i32, i32
  }
  func.func @transform_5(%arg0: i32, %arg1: i32) -> (i32, i32, i32) {
    %c0_i32 = arith.constant 0 : i32
    %c0_i32_0 = arith.constant 0 : i32
    %c0_i32_1 = arith.constant 0 : i32
    return %arg1, %c0_i32, %c0_i32_0 : i32, i32, i32
  }
  func.func @transform_6(%arg0: i32, %arg1: i32) -> (i32, i32, i32) {
    %c0_i32 = arith.constant 0 : i32
    %c0_i32_0 = arith.constant 0 : i32
    %c0_i32_1 = arith.constant 0 : i32
    return %arg1, %c0_i32, %c0_i32_0 : i32, i32, i32
  }
  func.func @transform_7(%arg0: i32, %arg1: i32) -> (i32, i32, i32) {
    %c0_i32 = arith.constant 0 : i32
    %c0_i32_0 = arith.constant 0 : i32
    %c0_i32_1 = arith.constant 0 : i32
    return %arg1, %c0_i32, %c0_i32_0 : i32, i32, i32
  }
  func.func @transform_8(%arg0: i32, %arg1: i32) -> (i32, i32, i32) {
    %c0_i32 = arith.constant 0 : i32
    %c0_i32_0 = arith.constant 0 : i32
    %c0_i32_1 = arith.constant 0 : i32
    return %arg1, %c0_i32, %c0_i32_0 : i32, i32, i32
  }
  func.func @transform_9(%arg0: i32, %arg1: i32) -> (i32, i32, i32) {
    %c0_i32 = arith.constant 0 : i32
    %c0_i32_0 = arith.constant 0 : i32
    %c0_i32_1 = arith.constant 0 : i32
    return %arg1, %c0_i32, %c0_i32_0 : i32, i32, i32
  }
  func.func @transform_10(%arg0: i32, %arg1: i32) -> (i32, i32, i32) {
    %c0_i32 = arith.constant 0 : i32
    %c0_i32_0 = arith.constant 0 : i32
    %c0_i32_1 = arith.constant 0 : i32
    return %arg1, %c0_i32, %c0_i32_0 : i32, i32, i32
  }
  func.func @transform_11(%arg0: i32, %arg1: i32) -> (i32, i32, i32) {
    %c0_i32 = arith.constant 0 : i32
    %c0_i32_0 = arith.constant 0 : i32
    %c0_i32_1 = arith.constant 0 : i32
    return %arg1, %c0_i32, %c0_i32_0 : i32, i32, i32
  }
  func.func @transform_12(%arg0: i32, %arg1: i32) -> (i32, i32, i32) {
    %c0_i32 = arith.constant 0 : i32
    %c0_i32_0 = arith.constant 0 : i32
    %c0_i32_1 = arith.constant 0 : i32
    return %arg1, %c0_i32, %c0_i32_0 : i32, i32, i32
  }
  func.func @transform_13(%arg0: i32, %arg1: i32) -> (i32, i32, i32) {
    %c0_i32 = arith.constant 0 : i32
    %c0_i32_0 = arith.constant 0 : i32
    %c0_i32_1 = arith.constant 0 : i32
    return %arg0, %c0_i32, %c0_i32_0 : i32, i32, i32
  }
}

</mosaic_0001>

<bundles_post_ra>
// kernel: gpt_stage_last.3
= control target key start
LH: loop header
LB: loop body
LE: loop exit
PB: predicated region body
PF: predicated region fallthrough
CT: control target
= control target key end

     0   :  { %9 = vsyncpa [#allocation4], 0  ;;  %s748_s0 = inlined_call_operand.vmem [shape: f32[2,8,32], index: 0, kind: input, shape index: {}]   ;;  %s749_s1 = inlined_call_operand.vmem [shape: f32[1,32], index: 1, kind: input, shape index: {}]   ;;  %s750_s2 = inlined_call_operand.vmem [shape: f32[1,32], index: 2, kind: input, shape index: {}]   ;;  %s751_s3 = inlined_call_operand.vmem [shape: bf16[32,128], index: 3, kind: input, shape index: {}]   ;;  %s752_s4 = inlined_call_operand.hbm [shape: f32[2,8,128], index: 4, kind: output, shape index: {}]  }
   0x1   :  { %11 = vsyncpa [#allocation4 + $0x1], 0  ;;  %s621_s15 = smov 0   ;;  %s623_s16 = smov 0  }
   0x2   :  { %s625_s17 = smov 0   ;;  %s627_s18 = smov 0  }
   0x3   :  { %s629_s19 = smov 0   ;;  %s631_s20 = smov 0  }
   0x4 LB: > { %s424_s21 = sadd.s32 4294967295, %s591_s20   ;;  %s425_s22 = sadd.s32 4294967294, %s591_s20   ;;  %s591_s20 = sphi %s631_s20, %s17_s20   ;;  %s587_s19 = sphi %s629_s19, %s759_s19   ;;  %s583_s18 = sphi %s627_s18, %s758_s18   ;;  %s579_s17 = sphi %s625_s17, %s757_s17   ;;  %s575_s16 = sphi %s623_s16, %s756_s16   ;;  %s571_s15 = sphi %s621_s15, %s755_s15  }
   0x5   : > { %s29_s23 = sadd.s32 1, %s587_s19  ;;  %s132_s24 = sadd.s32 1, %s579_s17 }
   0x6   : > { %p31_p0 = scmp.ge.s32.totalorder %s29_s23, 2  ;;  %p142_p1 = scmp.ne.s32.totalorder %s579_s17, %s575_s16 }
   0x7   : > { %p143_p2 = scmp.eq.s32.totalorder %s424_s21, 1  ;;  %p148_p3 = scmp.ne.s32.totalorder %s575_s16, %s571_s15 }
   0x8   : > { %s761_s23 = smov (%p31_p0, %s29_s23), 0  ;;  %p149_p5 = scmp.eq.s32.totalorder %s425_s22, 1 }
   0x9   : > { %p661_p4 = por %p143_p2, %p142_p1  ;;  %s127_s26 = ssub.s32 %s587_s19, %s761_s23 }
   0xa   : > { %p429_p6 = scmp.ge.s32.totalorder %s591_s20, 1  ;;  %p130_p7 = scmp.eq.s32.totalorder %s127_s26, 0 }
   0xb   : > { %p668_p8 = por %p149_p5, %p148_p3  ;;  %p187_p9 = scmp.lt.s32.totalorder %s591_s20, 3 }
   0xc   : > { %s674_s28 = scalar_select %p130_p7, %s579_s17, %s132_s24  }
   0xd   : > { %p188_p10 = pnand %p429_p6, %p187_p9 }
   0xe   : > { %p216_p11 = scmp.lt.s32.totalorder (!%p188_p10), %s583_s18, 1  ;;  %vm232_vm0 = vcmask (!%p188_p10), 261120   ;;  %v509_v7 = vld [vmem:[%s751_s3] sm:$0xff] (!%p188_p10)   ;;  %v593_v8 = vmov (!%p188_p10), 0.0   ;;  %v510_v9 = vld [vmem:[%s751_s3 + $0x8] sm:$0xff] (!%p188_p10)   ;;  %vm594_vm1 = vmmov (!%p188_p10), 0  }
   0xf   : > { %191 = sbr.rel (%p188_p10) target bundleno = 577 (0x241), region = 36  ;;  %444 = vmatprep.subr.bf16.mxu0 (!%p188_p10), %v593_v8  ;;  %448 = vmatprep.mubr.msk.bf16.mxu0 (!%p188_p10), %vm594_vm1, %v593_v8  ;;  %v432_v14 = vld [vmem:[%s749_s1] ss:$0 sm:$0xff] (!%p188_p10)  ;;  %vm262_vm2 = vcmask (!%p188_p10), 257024   ;;  %s213_s22 = sand.u32 (!%p188_p10), 1, %s575_s16  }
  0x10   : > { %445 = vmatpush3.bf16.msra.mxu0 (!%p188_p10), %v509_v7  ;;  %v433_v16 = vld [vmem:[%s750_s2] ss:$0 sm:$0xff] (!%p188_p10)  ;;  %s430_s24 = sshll.u32 (!%p188_p10), %s213_s22, 3  ;;  %s327_s8 = scalar_lea.sflag (!%p188_p10), [#allocation4], %s213_s22 }
  0x11   : > { %446 = vmatprep.subr.bf16.mxu0 (!%p188_p10), %v593_v8  ;;  %s215_s26 = scalar_lea.vmem (!%p188_p10), [#allocation3], %s430_s24 }
  0x14   : > { %447 = vmatpush3.bf16.msra.mxu0 (!%p188_p10), %v510_v9 }
  0x16   : > { %s217_s29 = scalar_select %p216_p11, %s583_s18, 1 }
  0x18   : > { %s431_s30 = sshll.u32 %s217_s29, 3  ;;  %s341_s29 = sshll.u32 %s215_s26, 4  ;;  %s698_s29 = int_to_ptr.vmem [resolvable:$true] %s341_s29 }
  0x19   : > { %s219_s7 = scalar_lea.vmem %s748_s0, %s431_s30  ;;  %s438_s30 = sshll.u32 %s583_s18, 7 }
  0x1a   : > { %v229_v0 = vld [vmem:[%s219_s7] sm:$0xff]  ;;  %s703_s7 = scalar_lea.hbm %s752_s4, %s438_s30  ;;  %s513_s9 = scalar_lea.vmem %s698_s29, 128 }
  0x1b   : > { %v233_v1 = vsel %vm232_vm0, %v229_v0, 0.0  ;;  %p514_p12 = scmp.ne.s32.totalorder %s698_s29, %s513_s9  ;;  %s595_s18 = smov [#allocation3]  }
  0x1c   : > { %234 = vadd.xlane.f32.xlu0 %v233_v1  ;;  %s517_s10 = sshll.u32 %s595_s18, 4  ;;  %s518_s10 = int_to_ptr.vmem [resolvable:$false] %s517_s10 }
  0x1d   : > { %p515_p13 = pnand %p514_p12, %p661_p4  ;;  %s519_s11 = scalar_lea.vmem %s518_s10, 256 }
  0x1e   : > { %p520_p1 = scmp.lt.s32.totalorder %s698_s29, %s518_s10  ;;  %p521_p2 = scmp.lt.s32.totalorder %s519_s11, %s513_s9 }
  0x1f   : > { %p516_p0 = pneg %p515_p13 }
  0x20   : > { %p522_p3 = por %p521_p2, %p520_p1 }
  0x22   : > { %p523_p5 = pnand %p522_p3, %p516_p0 }
  0xa9   : > { %v235_v2 = vpop.xlane.xlu0 %234 }
  0xaa   : > { %v237_v3 = vmul.f32 0.03125, %v235_v2 }
  0xac   : > { %v238_v4 = vsub.f32 %v229_v0, %v237_v3 }
  0xae   : > { %v239_v5 = vmul.f32 %v238_v4, %v238_v4 }
  0xb0   : > { %v240_v6 = vsel %vm232_vm0, %v239_v5, 0.0 }
  0xb1   : > { %241 = vadd.xlane.f32.xlu0 %v240_v6 }
 0x13e   : > { %v242_v10 = vpop.xlane.xlu0 %241 }
 0x13f   : > { %v243_v11 = vmul.f32 0.03125, %v242_v10 }
 0x141   : > { %v244_v12 = vadd.f32 1e-05, %v243_v11 }
 0x143   : > { %511 = vrsqrt.f32 %v244_v12 }
 0x14d   : > { %v512_v13 = vpop.eup %511 }
 0x14e   : > { %v246_v15 = vmul.f32 %v512_v13, %v238_v4 }
 0x150   : > { %v253_v17 = vmul.f32 %v432_v14, %v246_v15 }
 0x152   : > { %v260_v18 = vadd.f32 %v433_v16, %v253_v17 }
 0x154   : > { %v261_v19 = vpack.c.bf16 %v260_v18, %v260_v18 }
 0x156   : > { %263 = vst.msk [vmem:[#allocation2] sm:$0xf] %vm262_vm2, %v261_v19 }
 0x15d   : > { %v264_v20 = vld [vmem:[#allocation2] sm:$0xf] }
 0x15e   : > { %449 = vmatmul.mubr.msk.bf16.vlgmr.msra.gmra.mrb[0].mxu0 %vm232_vm0, %v264_v20 }
 0x231   : > { %v319_v21 = vpop.f32.mrb[0].mxu0 }
 0x232   : > { %325 = vst [vmem:[%s215_s26] sm:$0xff] %v319_v21  ;;  %v450_v22 = vpop.f32.mrb[1].mxu0 }
 0x233   : > { %v322_v23 = vpop.f32.mrb[2].mxu0 }
 0x234   : > { %526 = shalt.err (!%p523_p5)
}
 0x235   : > { %s527_s12 = scalar_lea.hbm %s703_s7, 128  ;;  %s531_s21 = scalar_lea.hbm %s752_s4, 256 }
 0x236   : > { %p528_p6 = scmp.ne.s32.totalorder %s703_s7, %s527_s12  ;;  %p532_p10 = scmp.lt.u32.totalorder %s703_s7, %s752_s4 }
 0x237   : > { %p533_p11 = scmp.lt.u32.totalorder %s531_s21, %s527_s12  ;;  %p535_p13 = scmp.lt.u32.totalorder %s527_s12, %s703_s7 }
 0x238   : > { %p529_p7 = pnand %p528_p6, %p661_p4 }
 0x239   : > { %p534_p12 = por %p533_p11, %p532_p10 }
 0x23a   : > { %p530_p9 = pneg %p529_p7 }
 0x23b   : > { %p536_p0 = por %p535_p13, %p534_p12 }
 0x23d   : > { %p537_p1 = pnand %p536_p0, %p530_p9 }
 0x23f   : > { %540 = shalt.err (!%p537_p1)
}
 0x240   : > { %452 = dma.vmem_to_hbm [thread:$0]  (%p661_p4), %s698_s29, 128, %s703_s7, %s327_s8   ;;  %v451_v24 = vpop.f32.mrb[3].mxu0 }
 0x241 PF: > { %p458_p2 = scmp.ge.s32.totalorder %s591_s20, 2  ;;  %s353_s26 = sand.u32 1, %s571_s15  }
 0x242   : > { %s354_s30 = scalar_lea.sflag [#allocation4], %s353_s26 }
 0x243   : > { %p455_p3 = pnand %p458_p2, %p668_p8 }
 0x245   : > { %566 = dma.done.wait (!%p455_p3), %s354_s30, 128  }
 0x246   : > { %568 = vsyncadd (!%p455_p3), %s354_s30, 4294967168  ;;  %s17_s20 = sadd.s32 1, %s591_s20   ;;  %s755_s15 = smov %s575_s16 }
 0x247   : > { %p14_p5 = scmp.ge.s32.totalorder %s17_s20, 4   ;;  %s756_s16 = smov %s579_s17 }
 0x248   : > { %s757_s17 = smov %s674_s28  ;;  %s758_s18 = smov %s587_s19 }
 0x249   : > { %s759_s19 = smov %s761_s23  ;;  %16 = sbr.rel (!%p14_p5) target bundleno = 4 (0x4), region = 78 }
 0x250   :  { %359 = vsyncpa [#allocation4], 1 }
 0x251   :  { %361 = vsyncpa [#allocation4 + $0x1], 1 }

// kernel: gpt_stage_last.2
= control target key start
LH: loop header
LB: loop body
LE: loop exit
PB: predicated region body
PF: predicated region fallthrough
CT: control target
= control target key end

     0   :  { %s2239_s25 = smov 0   ;;  %s2241_s26 = smov 0   ;;  %s2539_s0 = inlined_call_operand.vmem [shape: f32[2,8,32], index: 0, kind: input, shape index: {}]   ;;  %s2540_s1 = inlined_call_operand.vmem [shape: f32[2,1,32], index: 1, kind: input, shape index: {}]   ;;  %s2541_s2 = inlined_call_operand.vmem [shape: f32[2,1,32], index: 2, kind: input, shape index: {}]   ;;  %s2542_s3 = inlined_call_operand.vmem [shape: bf16[2,32,96], index: 3, kind: input, shape index: {}]   ;;  %s2543_s4 = inlined_call_operand.vmem [shape: f32[2,1,96], index: 4, kind: input, shape index: {}]   ;;  %s2544_s5 = inlined_call_operand.vmem [shape: bf16[2,32,32], index: 5, kind: input, shape index: {}]   ;;  %s2545_s6 = inlined_call_operand.vmem [shape: f32[2,1,32], index: 6, kind: input, shape index: {}]   ;;  %s2546_s7 = inlined_call_operand.vmem [shape: f32[2,1,32], index: 7, kind: input, shape index: {}]   ;;  %s2547_s8 = inlined_call_operand.vmem [shape: f32[2,1,32], index: 8, kind: input, shape index: {}]   ;;  %s2548_s9 = inlined_call_operand.vmem [shape: bf16[2,32,128], index: 9, kind: input, shape index: {}]   ;;  %s2549_s10 = inlined_call_operand.vmem [shape: f32[2,1,128], index: 10, kind: input, shape index: {}]   ;;  %s2550_s11 = inlined_call_operand.vmem [shape: bf16[2,128,32], index: 11, kind: input, shape index: {}]   ;;  %s2551_s12 = inlined_call_operand.vmem [shape: f32[2,1,32], index: 12, kind: input, shape index: {}]   ;;  %s2552_s13 = inlined_call_operand.vmem [shape: f32[2,8,32], index: 13, kind: output, shape index: {}]  }
   0x1   :  { %2557 = sst [smem:[#allocation9_spill]] %s2539_s0  ;;  %s2243_s27 = smov 0  }
   0x2   :  { %2558 = sst [smem:[#allocation10_spill]] %s2541_s2  ;;  %s2245_s28 = smov 0  }
   0x3   :  { %2559 = sst [smem:[#allocation11_spill]] %s2542_s3  ;;  %s2247_s29 = smov 0  }
   0x4   :  { %2560 = sst [smem:[#allocation12_spill]] %s2544_s5 }
   0x5   :  { %2561 = sst [smem:[#allocation13_spill]] %s2552_s13 }
   0x6 LB: > { %2562 = sst [smem:[#allocation3_spill]] %s2144_s25  ;;  %s32_s30 = sadd.s32 1, %s2152_s27  ;;  %s2160_s29 = sphi %s2247_s29, %s23_s29   ;;  %s2156_s28 = sphi %s2245_s28, %s2586_s28   ;;  %s2152_s27 = sphi %s2243_s27, %s2585_s27   ;;  %s2148_s26 = sphi %s2241_s26, %s2584_s26   ;;  %s2144_s25 = sphi %s2239_s25, %s2583_s25  }
   0x7   : > { %2563 = sst [smem:[#allocation4_spill]] %s2152_s27  ;;  %s35_s14 = sadd.s32 1, %s2156_s28 }
   0x8   : > { %2564 = sst [smem:[#allocation5_spill]] %s2156_s28  ;;  %p33_p0 = scmp.ge.s32.totalorder %s32_s30, 2 }
   0x9   : > { %2565 = sst [smem:[#allocation6_spill]] %s2160_s29  ;;  %p1841_p1 = scmp.ge.s32.totalorder %s2160_s29, 1 }
   0xa   : > { %p502_p2 = scmp.lt.s32.totalorder %s2160_s29, 5  ;;  %s2588_s30 = smov (%p33_p0, %s32_s30), 0 }
   0xb   : > { %2566 = sst [smem:[#allocation7_spill]] %s2588_s30  ;;  %s2590_s14 = smov (!%p33_p0, %s35_s14), %s2156_s28 }
   0xc   : > { %p503_p3 = pnand %p1841_p1, %p502_p2  ;;  %p37_p4 = scmp.ge.s32.totalorder %s2590_s14, 2 }
   0xd   : > { %p588_p5 = scmp.lt.s32.totalorder (!%p503_p3), %s2148_s26, 1  ;;  %p592_p6 = scmp.lt.s32.totalorder (!%p503_p3), %s2144_s25, 1 }
   0xe   : > { %s2592_s14 = smov (%p37_p4, %s2590_s14), 0  ;;  %506 = sbr.rel (%p503_p3) target bundleno = 2568 (0xa08), region = 72 }
   0xf   : > { %2567 = sst [smem:[#allocation8_spill]] %s2592_s14  ;;  %s2568_s0 = sld [smem:[#allocation9_spill]] (!%p503_p3) }
  0x10   : > { %s2570_s3 = sld [smem:[#allocation11_spill]] (!%p503_p3)  ;;  %s2571_s5 = sld [smem:[#allocation12_spill]] (!%p503_p3) }
  0x15   : > { %s2594_s26 = smov (!%p588_p5, %s2148_s26), 1 }
  0x16   : > { %s2273_s15 = scalar_select %p592_p6, %s2144_s25, 1 }
  0x17   : > { %s1842_s16 = sshll.u32 %s2594_s26, 3 }
  0x18   : > { %s591_s19 = scalar_lea.vmem %s2568_s0, %s1842_s16  ;;  %s1890_s30 = sshll.u32 %s2273_s15, 4 }
  0x19   : > { %s2290_s29 = scalar_lea.vmem %s2570_s3, %s1890_s30  ;;  %s2299_s0 = scalar_lea.vmem %s2571_s5, %s1890_s30 }
  0x1a   : > { %s2316_s26 = scalar_lea.vmem %s2548_s9, %s1890_s30  ;;  %s627_s13 = scalar_lea.vmem %s2549_s10, %s2273_s15 }
  0x1b   : > { %s1893_s5 = sshll.u32 %s2273_s15, 6  ;;  %s635_s23 = scalar_lea.vmem %s2551_s12, %s2273_s15 }
  0x1c   : > { %s2330_s22 = scalar_lea.vmem %s2550_s11, %s1893_s5  ;;  %s2572_s3 = sld [smem:[#allocation13_spill]] }
  0x1d   : > { %s2573_s30 = sld [smem:[#allocation3_spill]] }
  0x22   : > { %s2335_s2 = scalar_lea.vmem %s2572_s3, %s1842_s16 }
  0x23   : > { %p1852_p7 = scmp.ne.s32.totalorder %s2573_s30, 0 }
  0x24   : > { %v645_v0 = vld [vmem:[%s591_s19] sm:$0xff] (!%p1852_p7)  ;;  %vm646_vm0 = vcmask (!%p1852_p7), 261120  }
  0x25   : > { %644 = sbr.rel (%p1852_p7) target bundleno = 44 (0x2c), region = 76  ;;  %647 = vst.msk [vmem:[#allocation2] sm:$0xff] (!%p1852_p7), %vm646_vm0, %v645_v0 }
  0x2c PF: > { %v2338_v1 = vld [vmem:[#allocation2] sm:$0xff]  ;;  %vm651_vm1 = vcmask 261120   ;;  %v2162_v9 = vmov 0.0   ;;  %vm2163_vm2 = vmmov 0   ;;  %v2089_v10 = vld [vmem:[%s2290_s29 + $0x8] sm:$0xff]   ;;  %s2575_s25 = sld [smem:[#allocation10_spill]]  ;;  %s2577_s21 = scalar_lea.vmem %s2543_s4, %s2273_s15  ;;  %v973_v50 = vlaneseq }
  0x2d   : > { %v652_v2 = vsel %vm651_vm1, %v2338_v1, 0.0  ;;  %v2088_v8 = vld [vmem:[%s2290_s29] sm:$0xff]   ;;  %1933 = vmatprep.subr.bf16.mxu1 %v2162_v9  ;;  %1937 = vmatprep.mubr.msk.bf16.mxu1 %vm2163_vm2, %v2162_v9  ;;  %s2574_s29 = scalar_lea.vmem %s2540_s1, %s2273_s15  ;;  %s2164_s14 = smov 104   ;;  %vm779_vm3 = vcmask 64512   ;;  %vm1037_vm5 = vcmask 1043456  }
  0x2e   : > { %653 = vadd.xlane.f32.xlu0 %v652_v2  ;;  %1934 = vmatpush3.bf16.msra.mxu1 %v2088_v8  ;;  %v1853_v15 = vld [vmem:[%s2574_s29] ss:$0 sm:$0xff]  ;;  %s2165_s24 = smov 120   ;;  %s2166_s27 = smov 112   ;;  %v974_v51 = vshrl.u32 %v973_v50, 7  ;;  %v976_v52 = vand.u32 127, %v973_v50 }
  0x2f   : > { %1959 = vmatprep.subr.bf16.mxu0 %v2162_v9  ;;  %1935 = vmatprep.subr.bf16.mxu1 %v2162_v9  ;;  %v1855_v21 = vld [vmem:[%s2577_s21] ss:$0 sm:$0xff]  ;;  %s2167_s28 = smov 96   ;;  %s2168_s30 = smov 64  }
  0x30   : > { %1961 = vmatprep.mubr.msk.bf16.mxu0 %vm2163_vm2, %v2162_v9  ;;  %vm977_vm4 = vcmp.ge.s32.totalorder %v974_v51, %v976_v52  ;;  %s2578_s5 = scalar_lea.vmem %s2545_s6, %s2273_s15  ;;  %s2579_s19 = scalar_lea.vmem %s2546_s7, %s2273_s15 }
  0x31   : > { %s2581_s21 = sld [smem:[#allocation3_spill]] }
  0x32   : > { %1936 = vmatpush3.bf16.msra.mxu1 %v2089_v10  ;;  %s2576_s17 = scalar_lea.vmem %s2575_s25, %s2273_s15 }
  0x33   : > { %1941 = vmatprep.subr.bf16.mxu1 %v2162_v9  ;;  %v1854_v17 = vld [vmem:[%s2576_s17] ss:$0 sm:$0xff]  ;;  %s2580_s17 = scalar_lea.vmem %s2547_s8, %s2273_s15 }
  0x37   : > { %p1887_p8 = scmp.ne.s32.totalorder %s2581_s21, 1 }
  0xbb   : > { %v654_v3 = vpop.xlane.xlu0 %653 }
  0xbc   : > { %v656_v4 = vmul.f32 0.03125, %v654_v3 }
  0xbe   : > { %v657_v5 = vsub.f32 %v2338_v1, %v656_v4 }
  0xc0   : > { %v658_v6 = vmul.f32 %v657_v5, %v657_v5 }
  0xc2   : > { %v659_v7 = vsel %vm651_vm1, %v658_v6, 0.0 }
  0xc3   : > { %660 = vadd.xlane.f32.xlu0 %v659_v7 }
 0x150   : > { %v661_v11 = vpop.xlane.xlu0 %660 }
 0x151   : > { %v662_v12 = vmul.f32 0.03125, %v661_v11 }
 0x153   : > { %v663_v13 = vadd.f32 1e-05, %v662_v12 }
 0x155   : > { %2100 = vrsqrt.f32 %v663_v13 }
 0x15f   : > { %v2101_v14 = vpop.eup %2100 }
 0x160   : > { %v665_v16 = vmul.f32 %v2101_v14, %v657_v5 }
 0x162   : > { %v672_v18 = vmul.f32 %v1853_v15, %v665_v16 }
 0x164   : > { %v679_v19 = vadd.f32 %v1854_v17, %v672_v18 }
 0x166   : > { %v680_v20 = vpack.c.bf16 %v679_v19, %v679_v19 }
 0x168   : > { %1938 = vmatmul.mubr.msk.bf16.vlgmr.msra.gmra.mrb[0].mxu1 %vm651_vm1, %v680_v20 }
 0x169   : > { %1943 = vmatprep.mubr.msk.bf16.mxu1 %vm2163_vm2, %v2162_v9 }
 0x23b   : > { %v741_v22 = vpop.f32.mrb[0].mxu1 }
 0x23c   : > { %v742_v23 = vadd.f32 %v1855_v21, %v741_v22  ;;  %v1939_v24 = vpop.f32.mrb[1].mxu1 }
 0x23d   : > { %v744_v25 = vpop.f32.mrb[2].mxu1 }
 0x23e   : > { %765 = vrot.lane.b32.xlu0 %v742_v23, %s2164_s14  ;;  %759 = vrot.lane.b32.xlu1 %v742_v23, %s2165_s24  ;;  %v1940_v26 = vpop.f32.mrb[3].mxu1  ;;  %v747_v27 = vmul.f32 0.35355338, %v742_v23  ;;  %v2372_v28 = vpack.c.bf16 %v742_v23, %v742_v23 }
 0x240   : > { %v768_v37 = vpack.c.bf16 %v747_v27, %v747_v27 }
 0x242   : > { %762 = vrot.lane.b32.xlu1 %v742_v23, %s2166_s27  ;;  %755 = vrot.lane.b32.xlu0 %v747_v27, %s2164_s14 }
 0x246   : > { %777 = vrot.lane.b32.xlu1 %v2372_v28, %s2167_s28 }
 0x2b0   : > { %v760_v29 = vpop.permute.xlu1 %759  ;;  %v766_v35 = vpop.permute.xlu0 %765 }
 0x2b1   : > { %v2375_v30 = vpack.c.bf16 %v760_v29, %v760_v29  ;;  %v2383_v36 = vpack.c.bf16 %v766_v35, %v766_v35 }
 0x2b3   : > { %827 = vrot.lane.b32.xlu1 %v2375_v30, %s2167_s28 }
 0x2b4   : > { %v763_v31 = vpop.permute.xlu1 %762  ;;  %v756_v46 = vpop.permute.xlu0 %755 }
 0x2b5   : > { %v2378_v33 = vpack.c.bf16 %v763_v31, %v763_v31  ;;  %v771_v49 = vpack.c.bf16 %v756_v46, %v756_v46 }
 0x2b7   : > { %749 = vrot.lane.b32.xlu1 %v747_v27, %s2165_s24 }
 0x2b8   : > { %v778_v32 = vpop.permute.xlu1 %777 }
 0x2b9   : > { %v784_v34 = vsel %vm779_vm3, %v778_v32, 0 }
 0x2ba   : > { %1942 = vmatpush3.bf16.xpose.msra.mxu1 %v784_v34 }
 0x2bb   : > { %876 = vrot.lane.b32.xlu1 %v2378_v33, %s2167_s28  ;;  %1947 = vmatprep.subr.bf16.mxu1 %v2162_v9 }
 0x2bf   : > { %925 = vrot.lane.b32.xlu1 %v2383_v36, %s2167_s28 }
 0x2c1   : > { %1944 = vmatmul.mubr.msk.bf16.vlgmr.msra.gmra.mrb[4].mxu1 %vm779_vm3, %v768_v37 }
 0x2c2   : > { %1949 = vmatprep.mubr.msk.bf16.mxu1 %vm2163_vm2, %v2162_v9 }
 0x2c3   : > { %752 = vrot.lane.b32.xlu1 %v747_v27, %s2166_s27 }
 0x325   : > { %v828_v38 = vpop.permute.xlu1 %827 }
 0x326   : > { %v833_v39 = vsel %vm779_vm3, %v828_v38, 0 }
 0x327   : > { %1948 = vmatpush3.bf16.xpose.msra.mxu1 %v833_v39 }
 0x328   : > { %1953 = vmatprep.subr.bf16.mxu1 %v2162_v9 }
 0x329   : > { %v750_v40 = vpop.permute.xlu1 %749 }
 0x32a   : > { %v769_v41 = vpack.c.bf16 %v750_v40, %v750_v40 }
 0x32d   : > { %v877_v42 = vpop.permute.xlu1 %876 }
 0x32e   : > { %v882_v43 = vsel %vm779_vm3, %v877_v42, 0  ;;  %1950 = vmatmul.mubr.msk.bf16.vlgmr.msra.gmra.mrb[8].mxu1 %vm779_vm3, %v769_v41 }
 0x32f   : > { %1954 = vmatpush3.bf16.xpose.msra.mxu1 %v882_v43  ;;  %1955 = vmatprep.mubr.msk.bf16.mxu1 %vm2163_vm2, %v2162_v9 }
 0x330   : > { %1965 = vmatprep.subr.bf16.mxu1 %v2162_v9 }
 0x331   : > { %v926_v44 = vpop.permute.xlu1 %925 }
 0x332   : > { %v931_v45 = vsel %vm779_vm3, %v926_v44, 0 }
 0x333   : > { %1960 = vmatpush3.bf16.xpose.msra.mxu0 %v931_v45 }
 0x334   : > { %1971 = vmatprep.subr.bf16.mxu0 %v2162_v9 }
 0x335   : > { %v753_v47 = vpop.permute.xlu1 %752 }
 0x336   : > { %v770_v48 = vpack.c.bf16 %v753_v47, %v753_v47 }
 0x338   : > { %1956 = vmatmul.mubr.msk.bf16.vlgmr.msra.gmra.mrb[12].mxu1 %vm779_vm3, %v770_v48 }
 0x339   : > { %1967 = vmatprep.mubr.msk.bf16.mxu1 %vm2163_vm2, %v2162_v9 }
 0x33a   : > { %1962 = vmatmul.mubr.msk.bf16.vlgmr.msra.gmra.mrb[0].mxu0 %vm779_vm3, %v771_v49 }
 0x33b   : > { %1973 = vmatprep.mubr.msk.bf16.mxu0 %vm2163_vm2, %v2162_v9 }
 0x394   : > { %v820_v53 = vpop.f32.mrb[4].mxu1 }
 0x395   : > { %v980_v54 = vsel %vm977_vm4, %v820_v53, -1e+09  ;;  %v1945_v55 = vpop.f32.mrb[5].mxu1 }
 0x396   : > { %v823_v56 = vpop.f32.mrb[6].mxu1  ;;  %v984_v57 = vsel %vm779_vm3, %v980_v54, -inf }
 0x397   : > { %985 = vmax.xlane.f32.xlu1 %v984_v57  ;;  %v1946_v58 = vpop.f32.mrb[7].mxu1  ;;  %v1226_v57 = vld [vmem:[%s2299_s0] sm:$0xf] }
 0x401   : > { %v869_v59 = vpop.f32.mrb[8].mxu1 }
 0x402   : > { %v981_v60 = vsel %vm977_vm4, %v869_v59, -1e+09  ;;  %v1951_v61 = vpop.f32.mrb[9].mxu1 }
 0x403   : > { %v872_v62 = vpop.f32.mrb[10].mxu1  ;;  %v987_v63 = vsel %vm779_vm3, %v981_v60, -inf }
 0x404   : > { %988 = vmax.xlane.f32.xlu0 %v987_v63  ;;  %v1952_v0 = vpop.f32.mrb[11].mxu1  ;;  %v1279_v62 = vsel %vm1037_vm5, %v1226_v57, 0  ;;  %v1371_v63 = vld [vmem:[%s2299_s0 + $0xc] sm:$0xf] }
 0x40b   : > { %v918_v2 = vpop.f32.mrb[12].mxu1 }
 0x40c   : > { %v982_v3 = vsel %vm977_vm4, %v918_v2, -1e+09  ;;  %v1957_v4 = vpop.f32.mrb[13].mxu1 }
 0x40d   : > { %v921_v5 = vpop.f32.mrb[14].mxu1  ;;  %v967_v6 = vpop.f32.mrb[0].mxu0  ;;  %v990_v7 = vsel %vm779_vm3, %v982_v3, -inf  ;;  %v1376_v4 = vsel %vm1037_vm5, %v1371_v63, 0 }
 0x40e   : > { %v983_v8 = vsel %vm977_vm4, %v967_v6, -1e+09  ;;  %v1963_v10 = vpop.f32.mrb[1].mxu0  ;;  %991 = vmax.xlane.f32.xlu0 %v990_v7  ;;  %v1958_v11 = vpop.f32.mrb[15].mxu1  ;;  %v1322_v7 = vld [vmem:[%s2299_s0 + $0x8] sm:$0xf] }
 0x40f   : > { %v970_v12 = vpop.f32.mrb[2].mxu0  ;;  %v993_v13 = vsel %vm779_vm3, %v983_v8, -inf }
 0x410   : > { %v1964_v14 = vpop.f32.mrb[3].mxu0  ;;  %994 = vmax.xlane.f32.xlu1 %v993_v13  ;;  %v1327_v12 = vsel %vm1037_vm5, %v1322_v7, 0  ;;  %v2098_v7 = vld [vmem:[%s2330_s22 + $0x30] sm:$0xff]  }
 0x421   : > { %1081 = vrot.lane.b32.xlu1 %v2375_v30, %s2168_s30 }
 0x424   : > { %1032 = vrot.lane.b32.xlu0 %v2372_v28, %s2168_s30  ;;  %v986_v15 = vpop.xlane.xlu1 %985 }
 0x425   : > { %v996_v16 = vsub.f32 %v980_v54, %v986_v15  ;;  %v1228_v54 = vld [vmem:[%s2299_s0 + $0x4] sm:$0xf] }
 0x427   : > { %v1000_v17 = vmul.f32 1.442695, %v996_v16 }
 0x429   : > { %2102 = vpow2.f32 %v1000_v17 }
 0x433   : > { %v2103_v18 = vpop.eup %2102 }
 0x434   : > { %v1008_v19 = vsel %vm779_vm3, %v2103_v18, 0.0 }
 0x443   : > { %1009 = vadd.xlane.f32.xlu0 %v1008_v19 }
 0x491   : > { %v989_v20 = vpop.xlane.xlu0 %988 }
 0x492   : > { %v997_v21 = vsub.f32 %v981_v60, %v989_v20  ;;  %v1233_v60 = vsel %vm1037_vm5, %v1228_v54, 0  ;;  %v2092_v54 = vld [vmem:[%s2330_s22] sm:$0xff]  }
 0x494   : > { %v1002_v22 = vmul.f32 1.442695, %v997_v21 }
 0x496   : > { %2104 = vpow2.f32 %v1002_v22 }
 0x49b   : > { %v992_v23 = vpop.xlane.xlu0 %991 }
 0x49c   : > { %v998_v24 = vsub.f32 %v982_v3, %v992_v23 }
 0x49d   : > { %v995_v25 = vpop.xlane.xlu1 %994 }
 0x49e   : > { %v1004_v26 = vmul.f32 1.442695, %v998_v24  ;;  %v999_v27 = vsub.f32 %v983_v8, %v995_v25 }
 0x49f   : > { %v1033_v29 = vpop.permute.xlu0 %1032 }
 0x4a0   : > { %v2105_v28 = vpop.eup %2104  ;;  %2106 = vpow2.f32 %v1004_v26  ;;  %v1006_v30 = vmul.f32 1.442695, %v999_v27  ;;  %v1039_v31 = vsel %vm1037_vm5, %v1033_v29, 0 }
 0x4a1   : > { %v1082_v32 = vpop.permute.xlu1 %1081  ;;  %1966 = vmatpush3.bf16.msra.mxu1 %v1039_v31  ;;  %v1011_v34 = vsel %vm779_vm3, %v2105_v28, 0.0 }
 0x4a2   : > { %2108 = vpow2.f32 %v1006_v30  ;;  %v1087_v35 = vsel %vm1037_vm5, %v1082_v32, 0  ;;  %1012 = vadd.xlane.f32.xlu1 %v1011_v34  ;;  %1977 = vmatprep.subr.bf16.mxu1 %v2162_v9 }
 0x4a3   : > { %1972 = vmatpush3.bf16.msra.mxu0 %v1087_v35 }
 0x4a4   : > { %1983 = vmatprep.subr.bf16.mxu0 %v2162_v9 }
 0x4aa   : > { %v2107_v37 = vpop.eup %2106 }
 0x4ab   : > { %v1014_v38 = vsel %vm779_vm3, %v2107_v37, 0.0 }
 0x4ac   : > { %v2109_v39 = vpop.eup %2108  ;;  %1015 = vadd.xlane.f32.xlu0 %v1014_v38 }
 0x4ad   : > { %v1017_v40 = vsel %vm779_vm3, %v2109_v39, 0.0 }
 0x4ae   : > { %1018 = vadd.xlane.f32.xlu1 %v1017_v40 }
 0x4bf   : > { %1129 = vrot.lane.b32.xlu1 %v2378_v33, %s2168_s30 }
 0x4c2   : > { %1177 = vrot.lane.b32.xlu0 %v2383_v36, %s2168_s30 }
 0x4d0   : > { %v1010_v41 = vpop.xlane.xlu0 %1009 }
 0x4d1   : > { %2110 = vrcp.f32 %v1010_v41 }
 0x4db   : > { %v2111_v42 = vpop.eup %2110 }
 0x4dc   : > { %v1024_v43 = vmul.f32 %v2111_v42, %v2103_v18 }
 0x4de   : > { %v1028_v44 = vpack.c.bf16 %v1024_v43, %v1024_v43 }
 0x4e0   : > { %1968 = vmatmul.mubr.msk.bf16.vlgmr.msra.gmra.mrb[16].mxu1 %vm779_vm3, %v1028_v44  ;;  %v1871_v44 = vld [vmem:[%s2578_s5] ss:$0 sm:$0xff] }
 0x4e1   : > { %1979 = vmatprep.mubr.msk.bf16.mxu1 %vm2163_vm2, %v2162_v9 }
 0x52f   : > { %v1013_v45 = vpop.xlane.xlu1 %1012 }
 0x530   : > { %2112 = vrcp.f32 %v1013_v45 }
 0x539   : > { %v1016_v46 = vpop.xlane.xlu0 %1015 }
 0x53a   : > { %v2113_v47 = vpop.eup %2112  ;;  %2114 = vrcp.f32 %v1016_v46 }
 0x53b   : > { %v1025_v33 = vmul.f32 %v2113_v47, %v2105_v28  ;;  %v1019_v48 = vpop.xlane.xlu1 %1018 }
 0x53c   : > { %2116 = vrcp.f32 %v1019_v48 }
 0x53d   : > { %v1178_v36 = vpop.permute.xlu0 %1177  ;;  %v1029_v49 = vpack.c.bf16 %v1025_v33, %v1025_v33 }
 0x53e   : > { %v1183_v50 = vsel %vm1037_vm5, %v1178_v36, 0 }
 0x53f   : > { %1974 = vmatmul.mubr.msk.bf16.vlgmr.msra.gmra.mrb[4].mxu0 %vm779_vm3, %v1029_v49  ;;  %v1130_v51 = vpop.permute.xlu1 %1129 }
 0x540   : > { %v1135_v52 = vsel %vm1037_vm5, %v1130_v51, 0  ;;  %1984 = vmatpush3.bf16.msra.mxu0 %v1183_v50  ;;  %1985 = vmatprep.mubr.msk.bf16.mxu0 %vm2163_vm2, %v2162_v9 }
 0x541   : > { %1978 = vmatpush3.bf16.msra.mxu1 %v1135_v52  ;;  %1995 = vmatprep.subr.bf16.mxu0 %v2162_v9 }
 0x542   : > { %1989 = vmatprep.subr.bf16.mxu1 %v2162_v9 }
 0x544   : > { %v2115_v53 = vpop.eup %2114 }
 0x545   : > { %v1026_v55 = vmul.f32 %v2115_v53, %v2107_v37  ;;  %v2090_v53 = vld [vmem:[%s2316_s26] sm:$0xff]  }
 0x546   : > { %v2117_v56 = vpop.eup %2116 }
 0x547   : > { %v1027_v58 = vmul.f32 %v2117_v56, %v2109_v39  ;;  %v1030_v59 = vpack.c.bf16 %v1026_v55, %v1026_v55 }
 0x549   : > { %1980 = vmatmul.mubr.msk.bf16.vlgmr.msra.gmra.mrb[20].mxu1 %vm779_vm3, %v1030_v59  ;;  %v1031_v61 = vpack.c.bf16 %v1027_v58, %v1027_v58  ;;  %v1872_v59 = vld [vmem:[%s2579_s19] ss:$0 sm:$0xff] }
 0x54a   : > { %1990 = vmatpush3.bf16.msra.mxu1 %v1233_v60  ;;  %1991 = vmatprep.mubr.msk.bf16.mxu1 %vm2163_vm2, %v2162_v9 }
 0x54b   : > { %1986 = vmatmul.mubr.msk.bf16.vlgmr.msra.gmra.mrb[8].mxu0 %vm779_vm3, %v1031_v61  ;;  %2001 = vmatprep.subr.bf16.mxu1 %v2162_v9  ;;  %v1873_v61 = vld [vmem:[%s2580_s17] ss:$0 sm:$0xff] }
 0x54c   : > { %1996 = vmatpush3.bf16.msra.mxu0 %v1279_v62  ;;  %1997 = vmatprep.mubr.msk.bf16.mxu0 %vm2163_vm2, %v2162_v9 }
 0x54d   : > { %2007 = vmatprep.subr.bf16.mxu0 %v2162_v9 }
 0x5b3   : > { %v1075_v0 = vpop.f32.mrb[16].mxu1 }
 0x5b4   : > { %v1225_v2 = vpack.c.bf16 %v1075_v0, %v1075_v0  ;;  %v1969_v3 = vpop.f32.mrb[17].mxu1 }
 0x5b5   : > { %v1078_v5 = vpop.f32.mrb[18].mxu1  ;;  %v2094_v3 = vld [vmem:[%s2330_s22 + $0x10] sm:$0xff]  }
 0x5b6   : > { %v1970_v6 = vpop.f32.mrb[19].mxu1  ;;  %1998 = vmatmul.mubr.msk.bf16.vlgmr.msra.gmra.mrb[12].mxu0 %vm779_vm3, %v1225_v2  ;;  %v2093_v2 = vld [vmem:[%s2330_s22 + $0x8] sm:$0xff]   ;;  %v2096_v5 = vld [vmem:[%s2330_s22 + $0x20] sm:$0xff]  }
 0x5b7   : > { %2008 = vmatpush3.bf16.msra.mxu0 %v1376_v4  ;;  %2009 = vmatprep.mubr.msk.bf16.mxu0 %vm2163_vm2, %v2162_v9  ;;  %v2095_v4 = vld [vmem:[%s2330_s22 + $0x18] sm:$0xff]   ;;  %v2097_v6 = vld [vmem:[%s2330_s22 + $0x28] sm:$0xff]  }
 0x5b8   : > { %2021 = vmatprep.subr.bf16.mxu0 %v2162_v9 }
 0x612   : > { %v1123_v8 = vpop.f32.mrb[4].mxu0 }
 0x613   : > { %v1227_v10 = vpack.c.bf16 %v1123_v8, %v1123_v8  ;;  %v1975_v11 = vpop.f32.mrb[5].mxu0  ;;  %v2099_v8 = vld [vmem:[%s2330_s22 + $0x38] sm:$0xff]  }
 0x614   : > { %v1126_v13 = vpop.f32.mrb[6].mxu0 }
 0x615   : > { %v1976_v14 = vpop.f32.mrb[7].mxu0  ;;  %1992 = vmatmul.mubr.msk.bf16.vlgmr.msra.gmra.mrb[24].mxu1 %vm779_vm3, %v1227_v10  ;;  %v1874_v10 = vld [vmem:[%s627_s13] ss:$0 sm:$0xff] }
 0x616   : > { %2002 = vmatpush3.bf16.msra.mxu1 %v1327_v12  ;;  %2003 = vmatprep.mubr.msk.bf16.mxu1 %vm2163_vm2, %v2162_v9 }
 0x617   : > { %2013 = vmatprep.subr.bf16.mxu1 %v2162_v9 }
 0x61c   : > { %v1171_v15 = vpop.f32.mrb[20].mxu1 }
 0x61d   : > { %v1321_v16 = vpack.c.bf16 %v1171_v15, %v1171_v15  ;;  %v1981_v17 = vpop.f32.mrb[21].mxu1 }
 0x61e   : > { %v1174_v18 = vpop.f32.mrb[22].mxu1  ;;  %v1219_v19 = vpop.f32.mrb[8].mxu0 }
 0x61f   : > { %v1370_v20 = vpack.c.bf16 %v1219_v19, %v1219_v19  ;;  %v1982_v21 = vpop.f32.mrb[23].mxu1  ;;  %v1987_v22 = vpop.f32.mrb[9].mxu0  ;;  %2004 = vmatmul.mubr.msk.bf16.vlgmr.msra.gmra.mrb[28].mxu1 %vm779_vm3, %v1321_v16 }
 0x620   : > { %v1222_v23 = vpop.f32.mrb[10].mxu0  ;;  %2017 = vmatprep.mubr.msk.bf16.mxu1 %vm2163_vm2, %v2162_v9  ;;  %2014 = vmatpush3.bf16.msra.mxu1 %v2090_v53 }
 0x621   : > { %v1988_v24 = vpop.f32.mrb[11].mxu0  ;;  %2010 = vmatmul.mubr.msk.bf16.vlgmr.msra.gmra.mrb[16].mxu0 %vm779_vm3, %v1370_v20  ;;  %2015 = vmatprep.subr.bf16.mxu1 %v2162_v9 }
 0x622   : > { %2037 = vmatprep.mubr.msk.bf16.mxu0 %vm2163_vm2, %v2162_v9  ;;  %2022 = vmatpush3.bf16.msra.mxu0 %v2092_v54 }
 0x623   : > { %2023 = vmatprep.subr.bf16.mxu0 %v2162_v9 }
 0x626   : > { %2024 = vmatpush3.bf16.msra.mxu0 %v2093_v2 }
 0x627   : > { %2025 = vmatprep.subr.bf16.mxu0 %v2162_v9 }
 0x62a   : > { %2026 = vmatpush3.bf16.msra.mxu0 %v2094_v3 }
 0x62b   : > { %2027 = vmatprep.subr.bf16.mxu0 %v2162_v9 }
 0x62e   : > { %2028 = vmatpush3.bf16.msra.mxu0 %v2095_v4 }
 0x62f   : > { %2029 = vmatprep.subr.bf16.mxu0 %v2162_v9 }
 0x632   : > { %2030 = vmatpush3.bf16.msra.mxu0 %v2096_v5 }
 0x633   : > { %2031 = vmatprep.subr.bf16.mxu0 %v2162_v9 }
 0x636   : > { %2032 = vmatpush3.bf16.msra.mxu0 %v2097_v6 }
 0x637   : > { %2033 = vmatprep.subr.bf16.mxu0 %v2162_v9 }
 0x63a   : > { %2034 = vmatpush3.bf16.msra.mxu0 %v2098_v7 }
 0x63b   : > { %2035 = vmatprep.subr.bf16.mxu0 %v2162_v9 }
 0x63e   : > { %2036 = vmatpush3.bf16.msra.mxu0 %v2099_v8 }
 0x689   : > { %v1315_v25 = vpop.f32.mrb[12].mxu0 }
 0x68a   : > { %v1999_v26 = vpop.f32.mrb[13].mxu0 }
 0x68b   : > { %v1318_v27 = vpop.f32.mrb[14].mxu0 }
 0x68c   : > { %v2000_v29 = vpop.f32.mrb[15].mxu0 }
 0x6e8   : > { %v1269_v28 = vpop.f32.mrb[24].mxu1 }
 0x6e9   : > { %v1316_v30 = vadd.f32 %v1315_v25, %v1269_v28  ;;  %v1993_v31 = vpop.f32.mrb[25].mxu1  ;;  %v1878_v25 = vld [vmem:[%s635_s23] ss:$0 sm:$0xff] }
 0x6ea   : > { %v1272_v32 = vpop.f32.mrb[26].mxu1 }
 0x6eb   : > { %v1994_v34 = vpop.f32.mrb[27].mxu1 }
 0x6f2   : > { %v1363_v35 = vpop.f32.mrb[28].mxu1 }
 0x6f3   : > { %v1369_v37 = vadd.f32 %v1363_v35, %v1316_v30  ;;  %v2005_v38 = vpop.f32.mrb[29].mxu1 }
 0x6f4   : > { %v1366_v39 = vpop.f32.mrb[30].mxu1  ;;  %v1412_v40 = vpop.f32.mrb[16].mxu0 }
 0x6f5   : > { %v1418_v41 = vadd.f32 %v1412_v40, %v1369_v37  ;;  %v2006_v42 = vpop.f32.mrb[31].mxu1  ;;  %v2011_v43 = vpop.f32.mrb[17].mxu0 }
 0x6f6   : > { %v1415_v45 = vpop.f32.mrb[18].mxu0 }
 0x6f7   : > { %v1419_v46 = vadd.f32 %v1418_v41, %v2338_v1  ;;  %v2012_v47 = vpop.f32.mrb[19].mxu0  ;;  %v2091_v1 = vld [vmem:[%s2316_s26 + $0x8] sm:$0xff]  }
 0x6f8   : > { %2016 = vmatpush3.bf16.msra.mxu1 %v2091_v1 }
 0x6f9   : > { %v2474_v33 = vadd.f32 %v1871_v44, %v1419_v46 }
 0x6fb   : > { %v1430_v48 = vsel %vm651_vm1, %v2474_v33, 0.0 }
 0x6fc   : > { %1431 = vadd.xlane.f32.xlu1 %v1430_v48 }
 0x789   : > { %v1432_v36 = vpop.xlane.xlu1 %1431 }
 0x78a   : > { %v1433_v49 = vmul.f32 0.03125, %v1432_v36 }
 0x78c   : > { %v1434_v50 = vsub.f32 %v2474_v33, %v1433_v49 }
 0x78e   : > { %v1435_v51 = vmul.f32 %v1434_v50, %v1434_v50 }
 0x790   : > { %v1436_v52 = vsel %vm651_vm1, %v1435_v51, 0.0 }
 0x791   : > { %1437 = vadd.xlane.f32.xlu0 %v1436_v52 }
 0x81e   : > { %v1438_v55 = vpop.xlane.xlu0 %1437 }
 0x81f   : > { %v1439_v56 = vmul.f32 0.03125, %v1438_v55 }
 0x821   : > { %v1440_v57 = vadd.f32 1e-05, %v1439_v56 }
 0x823   : > { %2118 = vrsqrt.f32 %v1440_v57 }
 0x82d   : > { %v2119_v58 = vpop.eup %2118 }
 0x82e   : > { %v1442_v60 = vmul.f32 %v2119_v58, %v1434_v50 }
 0x830   : > { %v1449_v62 = vmul.f32 %v1872_v59, %v1442_v60 }
 0x832   : > { %v1456_v63 = vadd.f32 %v1873_v61, %v1449_v62 }
 0x834   : > { %v1457_v0 = vpack.c.bf16 %v1456_v63, %v1456_v63 }
 0x836   : > { %2018 = vmatmul.mubr.msk.bf16.vlgmr.msra.gmra.mrb[32].mxu1 %vm651_vm1, %v1457_v0 }
 0x909   : > { %v1518_v11 = vpop.f32.mrb[32].mxu1 }
 0x90a   : > { %v1519_v12 = vadd.f32 %v1874_v10, %v1518_v11  ;;  %v2019_v13 = vpop.f32.mrb[33].mxu1 }
 0x90b   : > { %v1521_v14 = vpop.f32.mrb[34].mxu1 }
 0x90c   : > { %v1525_v15 = vmul.f32 0.044715, %v1519_v12  ;;  %v2020_v16 = vpop.f32.mrb[35].mxu1  ;;  %v1524_v9 = vmul.f32 0.5, %v1519_v12 }
 0x90e   : > { %v1526_v17 = vmul.f32 %v1525_v15, %v1519_v12 }
 0x910   : > { %v1527_v18 = vmul.f32 %v1526_v17, %v1519_v12 }
 0x912   : > { %v1528_v19 = vadd.f32 %v1527_v18, %v1519_v12 }
 0x914   : > { %v1529_v20 = vmul.f32 0.7978845, %v1528_v19 }
 0x916   : > { %2120 = vtanh.f32 %v1529_v20 }
 0x920   : > { %v2121_v21 = vpop.eup %2120 }
 0x921   : > { %v1531_v22 = vadd.f32 1.0, %v2121_v21 }
 0x923   : > { %v1532_v23 = vmul.f32 %v1531_v22, %v1524_v9 }
 0x925   : > { %v1533_v24 = vpack.c.bf16 %v1532_v23, %v1532_v23 }
 0x927   : > { %2038 = vmatmul.mubr.bf16.vlgmr.msra.gmra.mrb[20].mxu0 %v1533_v24 }
 0x9f9   : > { %1650 = sbr.rel (%p1887_p8) target bundleno = 2568 (0xa08), region = 80 }
 0x9fa   : > { %v1639_v26 = vpop.f32.mrb[20].mxu0 }
 0x9fb   : > { %v1640_v27 = vadd.f32 %v1878_v25, %v1639_v26  ;;  %v2039_v29 = vpop.f32.mrb[21].mxu0 }
 0x9fc   : > { %v1642_v28 = vpop.f32.mrb[22].mxu0 }
 0x9fd   : > { %v1645_v30 = vadd.f32 %v1640_v27, %v2474_v33  ;;  %v2040_v31 = vpop.f32.mrb[23].mxu0 }
 0x9ff   : > { %1646 = vst.msk [vmem:[#allocation2] sm:$0xff] %vm651_vm1, %v1645_v30 }
 0xa06   : > { %v1651_v32 = vld [vmem:[#allocation2] sm:$0xff] }
 0xa07   : > { %1652 = vst.msk [vmem:[%s2335_s2] sm:$0xff] %vm651_vm1, %v1651_v32 }
 0xa08 PF: > { %s2582_s15 = sld [smem:[#allocation6_spill]]  ;;  %s2583_s25 = sld [smem:[#allocation4_spill]] }
 0xa09   : > { %s2584_s26 = sld [smem:[#allocation5_spill]]  ;;  %s2585_s27 = sld [smem:[#allocation7_spill]] }
 0xa0a   : > { %s2586_s28 = sld [smem:[#allocation8_spill]] }
 0xa0e   : > { %s23_s29 = sadd.s32 1, %s2582_s15  }
 0xa0f   : > { %p20_p9 = scmp.ge.s32.totalorder %s23_s29, 6  }
 0xa11   :  { %22 = sbr.rel (!%p20_p9) target bundleno = 6 (0x6), region = 146 }

</bundles_post_ra>
